<compile_context>
chip_gen: v5e
topology: v5e:2x2
jax: 0.10.0
libtpu: 0.0.40
codegen_flags: <defaults>
</compile_context>

<pallas_src>
import jax
import jax.numpy as jnp
from jax.experimental import pallas as pl
from jax.experimental.pallas import tpu as pltpu


# ----------------------------------------------------------------------------
# Pallas kernel: one bidirectional LSTM layer (recurrent part only)
# ----------------------------------------------------------------------------
def _bilstm_kernel(gx_ref, whh_ref, out_ref, h_scr, c_scr):
    """grid = (direction, time_chunk).

    gx_ref  : (1, TILE_T, B, 4H)  precomputed x @ W_ih^T + b for this direction
    whh_ref : (1, H, 4H)          recurrent weights for this direction
    out_ref : (1, TILE_T, B, H)   hidden-state outputs
    h_scr/c_scr : (B, H) f32      carries across time chunks
    """
    d = pl.program_id(0)          # direction: 0 = forward, 1 = backward
    c = pl.program_id(1)          # time chunk (sequential, 'arbitrary')
    tile_t = gx_ref.shape[1]
    H = h_scr.shape[1]

    @pl.when(c == 0)              # start of a direction: zero the carries
    def _():
        h_scr[...] = jnp.zeros_like(h_scr)
        c_scr[...] = jnp.zeros_like(c_scr)

    whh = whh_ref[0]              # (H, 4H), loaded once per chunk

    def run(time_indices):
        # Fully static unroll: every index below is a Python int, so all
        # gx reads / out writes are static VMEM slices.
        h = h_scr[...]
        cst = c_scr[...]
        for ti in time_indices:
            gates = gx_ref[0, ti] + jnp.dot(
                h, whh, preferred_element_type=jnp.float32)
            ig = jax.nn.sigmoid(gates[:, 0 * H:1 * H])
            fg = jax.nn.sigmoid(gates[:, 1 * H:2 * H])
            gg = jnp.tanh(gates[:, 2 * H:3 * H])
            og = jax.nn.sigmoid(gates[:, 3 * H:4 * H])
            cst = fg * cst + ig * gg
            h = og * jnp.tanh(cst)
            out_ref[0, ti] = h.astype(out_ref.dtype)
        h_scr[...] = h
        c_scr[...] = cst

    @pl.when(d == 0)
    def _():
        run(range(tile_t))                    # forward: 0 .. TILE_T-1

    @pl.when(d == 1)
    def _():
        run(range(tile_t - 1, -1, -1))        # backward: TILE_T-1 .. 0


# ----------------------------------------------------------------------------
# Wrappers
# ----------------------------------------------------------------------------
def _pick_time_tile(T, cap=32):
    """Largest divisor of T that is <= cap (cap bounds the static unroll)."""
    t = min(T, cap)
    while T % t != 0:
        t -= 1
    return t


def _run_bilstm(gx, whh):
    """gx: (2, T, B, 4H) precomputed input gates; whh: (2, H, 4H).

    Returns (2, T, B, H): out[0] forward hiddens, out[1] backward hiddens,
    both time-aligned with the input (backward already 'un-reversed').
    """
    _, T, B, G = gx.shape
    H = whh.shape[1]
    tile_t = _pick_time_tile(T)
    nc = T // tile_t

    # block time index: forward -> c, backward -> nc-1-c  (no x[::-1] copies)
    def t_map(d, c):
        return (d, d * (nc - 1) + (1 - 2 * d) * c, 0, 0)

    return pl.pallas_call(
        _bilstm_kernel,
        out_shape=jax.ShapeDtypeStruct((2, T, B, H), jnp.float32),
        grid_spec=pltpu.PrefetchScalarGridSpec(
            num_scalar_prefetch=0,
            grid=(2, nc),
            in_specs=[
                pl.BlockSpec((1, tile_t, B, G), t_map),
                pl.BlockSpec((1, H, G), lambda d, c: (d, 0, 0)),
            ],
            out_specs=pl.BlockSpec((1, tile_t, B, H), t_map),
            scratch_shapes=[pltpu.VMEM((B, H), jnp.float32),   # h carry
                            pltpu.VMEM((B, H), jnp.float32)],  # c carry
        ),
        compiler_params=pltpu.CompilerParams(
            # direction axis is independent (megacore-splittable on v7x);
            # time-chunk axis MUST stay sequential for the h/c carry.
            dimension_semantics=("parallel", "arbitrary")),
    )(gx, whh)


def lstm_filter_layer_forward(seqs, prep):
    """Matches LSTMFilterLayer.forward: 2-layer bidirectional LSTM + Linear."""
    x = seqs.astype(jnp.float32)
    p0, p1 = prep["l0"], prep["l1"]

    # ---- layer 0: hoisted input projection (both directions, all T at once)
    gx0 = jnp.einsum("tbd,zdg->ztbg", x, p0["wih"],
                     preferred_element_type=jnp.float32) + p0["b"][:, None, None, :]
    out0 = _run_bilstm(gx0, p0["whh"])            # (2, T, B, H)

    # ---- layer 1: consume the stacked (2,T,B,H) output directly (no concat)
    gx1 = jnp.einsum("dtbh,zdhg->ztbg", out0, p1["wih"],
                     preferred_element_type=jnp.float32) + p1["b"][:, None, None, :]
    out1 = _run_bilstm(gx1, p1["whh"])            # (2, T, B, H)

    # ---- output Linear on direction-split weights (no concat; tiny XLA matmul)
    return jnp.einsum("dtbh,dhs->tbs", out1, prep["lin_w"],
                      preferred_element_type=jnp.float32) + prep["lin_b"]


# ----------------------------------------------------------------------------
# Parameter handling
# ----------------------------------------------------------------------------
def init_params(key, obs_dim, hidden_dim, state_dim):
    """PyTorch-layout params, uniform(-1/sqrt(H), 1/sqrt(H))."""
    H = hidden_dim
    bound = 1.0 / float(H) ** 0.5

    def u(k, shape):
        return jax.random.uniform(k, shape, jnp.float32, -bound, bound)

    keys = iter(jax.random.split(key, 24))

    def lstm_dir(d_in):
        return (u(next(keys), (4 * H, d_in)),   # w_ih
                u(next(keys), (4 * H, H)),      # w_hh
                u(next(keys), (4 * H,)),        # b_ih
                u(next(keys), (4 * H,)))        # b_hh

    return {
        "l0_fwd": lstm_dir(obs_dim),
        "l0_bwd": lstm_dir(obs_dim),
        "l1_fwd": lstm_dir(2 * H),
        "l1_bwd": lstm_dir(2 * H),
        "lin_w": u(next(keys), (state_dim, 2 * H)),
        "lin_b": u(next(keys), (state_dim,)),
    }


def prepare_params(params):
    """One-time transpose / bias-fuse / direction-stack (not per call)."""
    H = params["l0_fwd"][1].shape[1]

    def layer(fwd, bwd, split_input):
        wih = jnp.stack([fwd[0].T, bwd[0].T]).astype(jnp.float32)  # (2, Din, 4H)
        if split_input:
            # layer-1 input dim is 2H = [fwd-half ; bwd-half] -> (2, 2, H, 4H)
            wih = wih.reshape(2, 2, H, 4 * H)
        return {
            "wih": wih,
            "whh": jnp.stack([fwd[1].T, bwd[1].T]).astype(jnp.float32),  # (2,H,4H)
            "b":   jnp.stack([fwd[2] + fwd[3],
                              bwd[2] + bwd[3]]).astype(jnp.float32),     # (2,4H)
        }

    return {
        "l0": layer(params["l0_fwd"], params["l0_bwd"], False),
        "l1": layer(params["l1_fwd"], params["l1_bwd"], True),
        # Linear weight split by direction: (state, 2H) -> (2, H, state)
        "lin_w": params["lin_w"].T.reshape(2, H, -1).astype(jnp.float32),
        "lin_b": params["lin_b"].astype(jnp.float32),
    }


# ----------------------------------------------------------------------------
# Pure-JAX reference (lax.scan) for correctness check
# ----------------------------------------------------------------------------
def _lstm_dir_ref(x, w_ih, w_hh, b_ih, b_hh):
    H = w_hh.shape[1]
    B = x.shape[1]

    def step(carry, xt):
        h, c = carry
        gates = xt @ w_ih.T + b_ih + h @ w_hh.T + b_hh
        i = jax.nn.sigmoid(gates[:, :H])
        f = jax.nn.sigmoid(gates[:, H:2 * H])
        g = jnp.tanh(gates[:, 2 * H:3 * H])
        o = jax.nn.sigmoid(gates[:, 3 * H:])
        c = f * c + i * g
        h = o * jnp.tanh(c)
        return (h, c), h

    init = (jnp.zeros((B, H), jnp.float32), jnp.zeros((B, H), jnp.float32))
    _, hs = jax.lax.scan(step, init, x)
    return hs


def _forward_ref(seqs, params):
    def bidir(x, fp, bp):
        return jnp.concatenate(
            [_lstm_dir_ref(x, *fp), _lstm_dir_ref(x[::-1], *bp)[::-1]], axis=-1)

    out0 = bidir(seqs, params["l0_fwd"], params["l0_bwd"])
    out1 = bidir(out0, params["l1_fwd"], params["l1_bwd"])
    return out1 @ params["lin_w"].T + params["lin_b"]


# ----------------------------------------------------------------------------
if __name__ == "__main__":
    seq_len, batch = 8, 4
    obs_dim, hidden_dim, state_dim = 16, 32, 8
    # NOTE: real workloads should use batch as a multiple of 8 (f32 sublanes);
    # B=4 here only matches the tiny self-test shapes.

    key = jax.random.PRNGKey(0)
    k_param, k_data = jax.random.split(key)
    params = init_params(k_param, obs_dim, hidden_dim, state_dim)
    prep = prepare_params(params)
    seqs = jax.random.normal(k_data, (seq_len, batch, obs_dim), jnp.float32)

    fwd = jax.jit(lstm_filter_layer_forward)
    states = jax.block_until_ready(fwd(seqs, prep))

    ref = _forward_ref(seqs, params)
    assert states.shape == (seq_len, batch, state_dim)
    assert jnp.allclose(states, ref, rtol=1e-4, atol=1e-5), \
        float(jnp.max(jnp.abs(states - ref)))

    print("KERNEL_OK")
</pallas_src>

<mosaic_0001>
module attributes {stable_mosaic.version = 11 : i64} {
  func.func @_bilstm_kernel(%arg0: i32, %arg1: i32, %arg2: memref<1x8x4x128xf32, #tpu.memory_space<vmem>>, %arg3: memref<1x32x128xf32, #tpu.memory_space<vmem>>, %arg4: memref<1x8x4x32xf32, #tpu.memory_space<vmem>>, %arg5: memref<4x32xf32, #tpu.memory_space<vmem>>, %arg6: memref<4x32xf32, #tpu.memory_space<vmem>>) attributes {dimension_semantics = [#tpu.dimension_semantics<parallel>, #tpu.dimension_semantics<arbitrary>], iteration_bounds = array<i64: 2, 1>, scalar_prefetch = 0 : i64, scratch_operands = 2 : i64, tpu.core_type = #tpu.core_type<tc>, window_params = [{transform_indices = @transform_0, window_bounds = array<i64: 1, 8, 4, 128>}, {transform_indices = @transform_1, window_bounds = array<i64: 1, 32, 128>}, {transform_indices = @transform_2, window_bounds = array<i64: 1, 8, 4, 32>}]} {
    %c0_i32 = arith.constant 0 : i32
    %0 = arith.cmpi eq, %arg1, %c0_i32 : i32
    %1 = arith.extui %0 : i1 to i32
    %c0_i32_0 = arith.constant 0 : i32
    %2 = arith.cmpi ne, %1, %c0_i32_0 : i32
    scf.if %2 {
      %cst = arith.constant 0.000000e+00 : f32
      %11 = vector.broadcast %cst : f32 to vector<4x32xf32>
      %c0_6 = arith.constant 0 : index
      %c0_7 = arith.constant 0 : index
      %12 = vector.load %arg5[%c0_6, %c0_7] : memref<4x32xf32, #tpu.memory_space<vmem>>, vector<4x32xf32>
      tpu.vector_store %arg5[%c0_6, %c0_7], %11 {strides = array<i32>} : memref<4x32xf32, #tpu.memory_space<vmem>>, vector<4x32xf32>,
      %cst_8 = arith.constant 0.000000e+00 : f32
      %13 = vector.broadcast %cst_8 : f32 to vector<4x32xf32>
      %c0_9 = arith.constant 0 : index
      %c0_10 = arith.constant 0 : index
      %14 = vector.load %arg6[%c0_9, %c0_10] : memref<4x32xf32, #tpu.memory_space<vmem>>, vector<4x32xf32>
      tpu.vector_store %arg6[%c0_9, %c0_10], %13 {strides = array<i32>} : memref<4x32xf32, #tpu.memory_space<vmem>>, vector<4x32xf32>,
    } else {
    }
    %c0 = arith.constant 0 : index
    %c0_1 = arith.constant 0 : index
    %c0_2 = arith.constant 0 : index
    %3 = vector.load %arg3[%c0, %c0_1, %c0_2] : memref<1x32x128xf32, #tpu.memory_space<vmem>>, vector<1x32x128xf32>
    %4 = vector.shape_cast %3 : vector<1x32x128xf32> to vector<32x128xf32>
    %c0_i32_3 = arith.constant 0 : i32
    %5 = arith.cmpi eq, %arg0, %c0_i32_3 : i32
    %6 = arith.extui %5 : i1 to i32
    %c0_i32_4 = arith.constant 0 : i32
    %7 = arith.cmpi ne, %6, %c0_i32_4 : i32
    scf.if %7 {
      %c0_6 = arith.constant 0 : index
      %c0_7 = arith.constant 0 : index
      %11 = vector.load %arg5[%c0_6, %c0_7] : memref<4x32xf32, #tpu.memory_space<vmem>>, vector<4x32xf32>
      %c0_8 = arith.constant 0 : index
      %c0_9 = arith.constant 0 : index
      %12 = vector.load %arg6[%c0_8, %c0_9] : memref<4x32xf32, #tpu.memory_space<vmem>>, vector<4x32xf32>
      %c0_10 = arith.constant 0 : index
      %c0_11 = arith.constant 0 : index
      %c0_12 = arith.constant 0 : index
      %c0_13 = arith.constant 0 : index
      %13 = vector.load %arg2[%c0_10, %c0_11, %c0_12, %c0_13] : memref<1x8x4x128xf32, #tpu.memory_space<vmem>>, vector<1x1x4x128xf32>
      %14 = vector.shape_cast %13 : vector<1x1x4x128xf32> to vector<4x128xf32>
      %cst = arith.constant dense<0.000000e+00> : vector<4x128xf32>
      %15 = tpu.matmul %11, %4, %cst {dimension_numbers = #tpu.dot_dimension_numbers<[1], [0], [0], [1], [0, 0, 1, 1], [], []>} : vector<4x32xf32>, vector<32x128xf32>, vector<4x128xf32> -> vector<4x128xf32>
      %16 = arith.addf %14, %15 : vector<4x128xf32>
      %17 = vector.extract_strided_slice %16 {offsets = [0, 0], sizes = [4, 32], strides = [1, 1]} : vector<4x128xf32> to vector<4x32xf32>
      %18 = arith.negf %17 : vector<4x32xf32>
      %19 = math.exp %18 : vector<4x32xf32>
      %cst_14 = arith.constant 1.000000e+00 : f32
      %20 = vector.broadcast %cst_14 : f32 to vector<4x32xf32>
      %21 = arith.addf %20, %19 : vector<4x32xf32>
      %22 = arith.divf %20, %21 : vector<4x32xf32>
      %23 = vector.extract_strided_slice %16 {offsets = [0, 32], sizes = [4, 32], strides = [1, 1]} : vector<4x128xf32> to vector<4x32xf32>
      %24 = arith.negf %23 : vector<4x32xf32>
      %25 = math.exp %24 : vector<4x32xf32>
      %cst_15 = arith.constant 1.000000e+00 : f32
      %26 = vector.broadcast %cst_15 : f32 to vector<4x32xf32>
      %27 = arith.addf %26, %25 : vector<4x32xf32>
      %28 = arith.divf %26, %27 : vector<4x32xf32>
      %29 = vector.extract_strided_slice %16 {offsets = [0, 64], sizes = [4, 32], strides = [1, 1]} : vector<4x128xf32> to vector<4x32xf32>
      %30 = math.tanh %29 : vector<4x32xf32>
      %31 = vector.extract_strided_slice %16 {offsets = [0, 96], sizes = [4, 32], strides = [1, 1]} : vector<4x128xf32> to vector<4x32xf32>
      %32 = arith.negf %31 : vector<4x32xf32>
      %33 = math.exp %32 : vector<4x32xf32>
      %cst_16 = arith.constant 1.000000e+00 : f32
      %34 = vector.broadcast %cst_16 : f32 to vector<4x32xf32>
      %35 = arith.addf %34, %33 : vector<4x32xf32>
      %36 = arith.divf %34, %35 : vector<4x32xf32>
      %37 = arith.mulf %28, %12 : vector<4x32xf32>
      %38 = arith.mulf %22, %30 : vector<4x32xf32>
      %39 = arith.addf %37, %38 : vector<4x32xf32>
      %40 = math.tanh %39 : vector<4x32xf32>
      %41 = arith.mulf %36, %40 : vector<4x32xf32>
      %c0_17 = arith.constant 0 : index
      %c0_18 = arith.constant 0 : index
      %c0_19 = arith.constant 0 : index
      %c0_20 = arith.constant 0 : index
      %42 = vector.load %arg4[%c0_17, %c0_18, %c0_19, %c0_20] : memref<1x8x4x32xf32, #tpu.memory_space<vmem>>, vector<1x1x4x32xf32>
      %43 = vector.shape_cast %42 : vector<1x1x4x32xf32> to vector<4x32xf32>
      %44 = vector.shape_cast %41 : vector<4x32xf32> to vector<1x1x4x32xf32>
      tpu.vector_store %arg4[%c0_17, %c0_18, %c0_19, %c0_20], %44 {strides = array<i32>} : memref<1x8x4x32xf32, #tpu.memory_space<vmem>>, vector<1x1x4x32xf32>,
      %c0_21 = arith.constant 0 : index
      %c1 = arith.constant 1 : index
      %c0_22 = arith.constant 0 : index
      %c0_23 = arith.constant 0 : index
      %45 = vector.load %arg2[%c0_21, %c1, %c0_22, %c0_23] : memref<1x8x4x128xf32, #tpu.memory_space<vmem>>, vector<1x1x4x128xf32>
      %46 = vector.shape_cast %45 : vector<1x1x4x128xf32> to vector<4x128xf32>
      %cst_24 = arith.constant dense<0.000000e+00> : vector<4x128xf32>
      %47 = tpu.matmul %41, %4, %cst_24 {dimension_numbers = #tpu.dot_dimension_numbers<[1], [0], [0], [1], [0, 0, 1, 1], [], []>} : vector<4x32xf32>, vector<32x128xf32>, vector<4x128xf32> -> vector<4x128xf32>
      %48 = arith.addf %46, %47 : vector<4x128xf32>
      %49 = vector.extract_strided_slice %48 {offsets = [0, 0], sizes = [4, 32], strides = [1, 1]} : vector<4x128xf32> to vector<4x32xf32>
      %50 = arith.negf %49 : vector<4x32xf32>
      %51 = math.exp %50 : vector<4x32xf32>
      %cst_25 = arith.constant 1.000000e+00 : f32
      %52 = vector.broadcast %cst_25 : f32 to vector<4x32xf32>
      %53 = arith.addf %52, %51 : vector<4x32xf32>
      %54 = arith.divf %52, %53 : vector<4x32xf32>
      %55 = vector.extract_strided_slice %48 {offsets = [0, 32], sizes = [4, 32], strides = [1, 1]} : vector<4x128xf32> to vector<4x32xf32>
      %56 = arith.negf %55 : vector<4x32xf32>
      %57 = math.exp %56 : vector<4x32xf32>
      %cst_26 = arith.constant 1.000000e+00 : f32
      %58 = vector.broadcast %cst_26 : f32 to vector<4x32xf32>
      %59 = arith.addf %58, %57 : vector<4x32xf32>
      %60 = arith.divf %58, %59 : vector<4x32xf32>
      %61 = vector.extract_strided_slice %48 {offsets = [0, 64], sizes = [4, 32], strides = [1, 1]} : vector<4x128xf32> to vector<4x32xf32>
      %62 = math.tanh %61 : vector<4x32xf32>
      %63 = vector.extract_strided_slice %48 {offsets = [0, 96], sizes = [4, 32], strides = [1, 1]} : vector<4x128xf32> to vector<4x32xf32>
      %64 = arith.negf %63 : vector<4x32xf32>
      %65 = math.exp %64 : vector<4x32xf32>
      %cst_27 = arith.constant 1.000000e+00 : f32
      %66 = vector.broadcast %cst_27 : f32 to vector<4x32xf32>
      %67 = arith.addf %66, %65 : vector<4x32xf32>
      %68 = arith.divf %66, %67 : vector<4x32xf32>
      %69 = arith.mulf %60, %39 : vector<4x32xf32>
      %70 = arith.mulf %54, %62 : vector<4x32xf32>
      %71 = arith.addf %69, %70 : vector<4x32xf32>
      %72 = math.tanh %71 : vector<4x32xf32>
      %73 = arith.mulf %68, %72 : vector<4x32xf32>
      %c0_28 = arith.constant 0 : index
      %c1_29 = arith.constant 1 : index
      %c0_30 = arith.constant 0 : index
      %c0_31 = arith.constant 0 : index
      %74 = vector.load %arg4[%c0_28, %c1_29, %c0_30, %c0_31] : memref<1x8x4x32xf32, #tpu.memory_space<vmem>>, vector<1x1x4x32xf32>
      %75 = vector.shape_cast %74 : vector<1x1x4x32xf32> to vector<4x32xf32>
      %76 = vector.shape_cast %73 : vector<4x32xf32> to vector<1x1x4x32xf32>
      tpu.vector_store %arg4[%c0_28, %c1_29, %c0_30, %c0_31], %76 {strides = array<i32>} : memref<1x8x4x32xf32, #tpu.memory_space<vmem>>, vector<1x1x4x32xf32>,
      %c0_32 = arith.constant 0 : index
      %c2 = arith.constant 2 : index
      %c0_33 = arith.constant 0 : index
      %c0_34 = arith.constant 0 : index
      %77 = vector.load %arg2[%c0_32, %c2, %c0_33, %c0_34] : memref<1x8x4x128xf32, #tpu.memory_space<vmem>>, vector<1x1x4x128xf32>
      %78 = vector.shape_cast %77 : vector<1x1x4x128xf32> to vector<4x128xf32>
      %cst_35 = arith.constant dense<0.000000e+00> : vector<4x128xf32>
      %79 = tpu.matmul %73, %4, %cst_35 {dimension_numbers = #tpu.dot_dimension_numbers<[1], [0], [0], [1], [0, 0, 1, 1], [], []>} : vector<4x32xf32>, vector<32x128xf32>, vector<4x128xf32> -> vector<4x128xf32>
      %80 = arith.addf %78, %79 : vector<4x128xf32>
      %81 = vector.extract_strided_slice %80 {offsets = [0, 0], sizes = [4, 32], strides = [1, 1]} : vector<4x128xf32> to vector<4x32xf32>
      %82 = arith.negf %81 : vector<4x32xf32>
      %83 = math.exp %82 : vector<4x32xf32>
      %cst_36 = arith.constant 1.000000e+00 : f32
      %84 = vector.broadcast %cst_36 : f32 to vector<4x32xf32>
      %85 = arith.addf %84, %83 : vector<4x32xf32>
      %86 = arith.divf %84, %85 : vector<4x32xf32>
      %87 = vector.extract_strided_slice %80 {offsets = [0, 32], sizes = [4, 32], strides = [1, 1]} : vector<4x128xf32> to vector<4x32xf32>
      %88 = arith.negf %87 : vector<4x32xf32>
      %89 = math.exp %88 : vector<4x32xf32>
      %cst_37 = arith.constant 1.000000e+00 : f32
      %90 = vector.broadcast %cst_37 : f32 to vector<4x32xf32>
      %91 = arith.addf %90, %89 : vector<4x32xf32>
      %92 = arith.divf %90, %91 : vector<4x32xf32>
      %93 = vector.extract_strided_slice %80 {offsets = [0, 64], sizes = [4, 32], strides = [1, 1]} : vector<4x128xf32> to vector<4x32xf32>
      %94 = math.tanh %93 : vector<4x32xf32>
      %95 = vector.extract_strided_slice %80 {offsets = [0, 96], sizes = [4, 32], strides = [1, 1]} : vector<4x128xf32> to vector<4x32xf32>
      %96 = arith.negf %95 : vector<4x32xf32>
      %97 = math.exp %96 : vector<4x32xf32>
      %cst_38 = arith.constant 1.000000e+00 : f32
      %98 = vector.broadcast %cst_38 : f32 to vector<4x32xf32>
      %99 = arith.addf %98, %97 : vector<4x32xf32>
      %100 = arith.divf %98, %99 : vector<4x32xf32>
      %101 = arith.mulf %92, %71 : vector<4x32xf32>
      %102 = arith.mulf %86, %94 : vector<4x32xf32>
      %103 = arith.addf %101, %102 : vector<4x32xf32>
      %104 = math.tanh %103 : vector<4x32xf32>
      %105 = arith.mulf %100, %104 : vector<4x32xf32>
      %c0_39 = arith.constant 0 : index
      %c2_40 = arith.constant 2 : index
      %c0_41 = arith.constant 0 : index
      %c0_42 = arith.constant 0 : index
      %106 = vector.load %arg4[%c0_39, %c2_40, %c0_41, %c0_42] : memref<1x8x4x32xf32, #tpu.memory_space<vmem>>, vector<1x1x4x32xf32>
      %107 = vector.shape_cast %106 : vector<1x1x4x32xf32> to vector<4x32xf32>
      %108 = vector.shape_cast %105 : vector<4x32xf32> to vector<1x1x4x32xf32>
      tpu.vector_store %arg4[%c0_39, %c2_40, %c0_41, %c0_42], %108 {strides = array<i32>} : memref<1x8x4x32xf32, #tpu.memory_space<vmem>>, vector<1x1x4x32xf32>,
      %c0_43 = arith.constant 0 : index
      %c3 = arith.constant 3 : index
      %c0_44 = arith.constant 0 : index
      %c0_45 = arith.constant 0 : index
      %109 = vector.load %arg2[%c0_43, %c3, %c0_44, %c0_45] : memref<1x8x4x128xf32, #tpu.memory_space<vmem>>, vector<1x1x4x128xf32>
      %110 = vector.shape_cast %109 : vector<1x1x4x128xf32> to vector<4x128xf32>
      %cst_46 = arith.constant dense<0.000000e+00> : vector<4x128xf32>
      %111 = tpu.matmul %105, %4, %cst_46 {dimension_numbers = #tpu.dot_dimension_numbers<[1], [0], [0], [1], [0, 0, 1, 1], [], []>} : vector<4x32xf32>, vector<32x128xf32>, vector<4x128xf32> -> vector<4x128xf32>
      %112 = arith.addf %110, %111 : vector<4x128xf32>
      %113 = vector.extract_strided_slice %112 {offsets = [0, 0], sizes = [4, 32], strides = [1, 1]} : vector<4x128xf32> to vector<4x32xf32>
      %114 = arith.negf %113 : vector<4x32xf32>
      %115 = math.exp %114 : vector<4x32xf32>
      %cst_47 = arith.constant 1.000000e+00 : f32
      %116 = vector.broadcast %cst_47 : f32 to vector<4x32xf32>
      %117 = arith.addf %116, %115 : vector<4x32xf32>
      %118 = arith.divf %116, %117 : vector<4x32xf32>
      %119 = vector.extract_strided_slice %112 {offsets = [0, 32], sizes = [4, 32], strides = [1, 1]} : vector<4x128xf32> to vector<4x32xf32>
      %120 = arith.negf %119 : vector<4x32xf32>
      %121 = math.exp %120 : vector<4x32xf32>
      %cst_48 = arith.constant 1.000000e+00 : f32
      %122 = vector.broadcast %cst_48 : f32 to vector<4x32xf32>
      %123 = arith.addf %122, %121 : vector<4x32xf32>
      %124 = arith.divf %122, %123 : vector<4x32xf32>
      %125 = vector.extract_strided_slice %112 {offsets = [0, 64], sizes = [4, 32], strides = [1, 1]} : vector<4x128xf32> to vector<4x32xf32>
      %126 = math.tanh %125 : vector<4x32xf32>
      %127 = vector.extract_strided_slice %112 {offsets = [0, 96], sizes = [4, 32], strides = [1, 1]} : vector<4x128xf32> to vector<4x32xf32>
      %128 = arith.negf %127 : vector<4x32xf32>
      %129 = math.exp %128 : vector<4x32xf32>
      %cst_49 = arith.constant 1.000000e+00 : f32
      %130 = vector.broadcast %cst_49 : f32 to vector<4x32xf32>
      %131 = arith.addf %130, %129 : vector<4x32xf32>
      %132 = arith.divf %130, %131 : vector<4x32xf32>
      %133 = arith.mulf %124, %103 : vector<4x32xf32>
      %134 = arith.mulf %118, %126 : vector<4x32xf32>
      %135 = arith.addf %133, %134 : vector<4x32xf32>
      %136 = math.tanh %135 : vector<4x32xf32>
      %137 = arith.mulf %132, %136 : vector<4x32xf32>
      %c0_50 = arith.constant 0 : index
      %c3_51 = arith.constant 3 : index
      %c0_52 = arith.constant 0 : index
      %c0_53 = arith.constant 0 : index
      %138 = vector.load %arg4[%c0_50, %c3_51, %c0_52, %c0_53] : memref<1x8x4x32xf32, #tpu.memory_space<vmem>>, vector<1x1x4x32xf32>
      %139 = vector.shape_cast %138 : vector<1x1x4x32xf32> to vector<4x32xf32>
      %140 = vector.shape_cast %137 : vector<4x32xf32> to vector<1x1x4x32xf32>
      tpu.vector_store %arg4[%c0_50, %c3_51, %c0_52, %c0_53], %140 {strides = array<i32>} : memref<1x8x4x32xf32, #tpu.memory_space<vmem>>, vector<1x1x4x32xf32>,
      %c0_54 = arith.constant 0 : index
      %c4 = arith.constant 4 : index
      %c0_55 = arith.constant 0 : index
      %c0_56 = arith.constant 0 : index
      %141 = vector.load %arg2[%c0_54, %c4, %c0_55, %c0_56] : memref<1x8x4x128xf32, #tpu.memory_space<vmem>>, vector<1x1x4x128xf32>
      %142 = vector.shape_cast %141 : vector<1x1x4x128xf32> to vector<4x128xf32>
      %cst_57 = arith.constant dense<0.000000e+00> : vector<4x128xf32>
      %143 = tpu.matmul %137, %4, %cst_57 {dimension_numbers = #tpu.dot_dimension_numbers<[1], [0], [0], [1], [0, 0, 1, 1], [], []>} : vector<4x32xf32>, vector<32x128xf32>, vector<4x128xf32> -> vector<4x128xf32>
      %144 = arith.addf %142, %143 : vector<4x128xf32>
      %145 = vector.extract_strided_slice %144 {offsets = [0, 0], sizes = [4, 32], strides = [1, 1]} : vector<4x128xf32> to vector<4x32xf32>
      %146 = arith.negf %145 : vector<4x32xf32>
      %147 = math.exp %146 : vector<4x32xf32>
      %cst_58 = arith.constant 1.000000e+00 : f32
      %148 = vector.broadcast %cst_58 : f32 to vector<4x32xf32>
      %149 = arith.addf %148, %147 : vector<4x32xf32>
      %150 = arith.divf %148, %149 : vector<4x32xf32>
      %151 = vector.extract_strided_slice %144 {offsets = [0, 32], sizes = [4, 32], strides = [1, 1]} : vector<4x128xf32> to vector<4x32xf32>
      %152 = arith.negf %151 : vector<4x32xf32>
      %153 = math.exp %152 : vector<4x32xf32>
      %cst_59 = arith.constant 1.000000e+00 : f32
      %154 = vector.broadcast %cst_59 : f32 to vector<4x32xf32>
      %155 = arith.addf %154, %153 : vector<4x32xf32>
      %156 = arith.divf %154, %155 : vector<4x32xf32>
      %157 = vector.extract_strided_slice %144 {offsets = [0, 64], sizes = [4, 32], strides = [1, 1]} : vector<4x128xf32> to vector<4x32xf32>
      %158 = math.tanh %157 : vector<4x32xf32>
      %159 = vector.extract_strided_slice %144 {offsets = [0, 96], sizes = [4, 32], strides = [1, 1]} : vector<4x128xf32> to vector<4x32xf32>
      %160 = arith.negf %159 : vector<4x32xf32>
      %161 = math.exp %160 : vector<4x32xf32>
      %cst_60 = arith.constant 1.000000e+00 : f32
      %162 = vector.broadcast %cst_60 : f32 to vector<4x32xf32>
      %163 = arith.addf %162, %161 : vector<4x32xf32>
      %164 = arith.divf %162, %163 : vector<4x32xf32>
      %165 = arith.mulf %156, %135 : vector<4x32xf32>
      %166 = arith.mulf %150, %158 : vector<4x32xf32>
      %167 = arith.addf %165, %166 : vector<4x32xf32>
      %168 = math.tanh %167 : vector<4x32xf32>
      %169 = arith.mulf %164, %168 : vector<4x32xf32>
      %c0_61 = arith.constant 0 : index
      %c4_62 = arith.constant 4 : index
      %c0_63 = arith.constant 0 : index
      %c0_64 = arith.constant 0 : index
      %170 = vector.load %arg4[%c0_61, %c4_62, %c0_63, %c0_64] : memref<1x8x4x32xf32, #tpu.memory_space<vmem>>, vector<1x1x4x32xf32>
      %171 = vector.shape_cast %170 : vector<1x1x4x32xf32> to vector<4x32xf32>
      %172 = vector.shape_cast %169 : vector<4x32xf32> to vector<1x1x4x32xf32>
      tpu.vector_store %arg4[%c0_61, %c4_62, %c0_63, %c0_64], %172 {strides = array<i32>} : memref<1x8x4x32xf32, #tpu.memory_space<vmem>>, vector<1x1x4x32xf32>,
      %c0_65 = arith.constant 0 : index
      %c5 = arith.constant 5 : index
      %c0_66 = arith.constant 0 : index
      %c0_67 = arith.constant 0 : index
      %173 = vector.load %arg2[%c0_65, %c5, %c0_66, %c0_67] : memref<1x8x4x128xf32, #tpu.memory_space<vmem>>, vector<1x1x4x128xf32>
      %174 = vector.shape_cast %173 : vector<1x1x4x128xf32> to vector<4x128xf32>
      %cst_68 = arith.constant dense<0.000000e+00> : vector<4x128xf32>
      %175 = tpu.matmul %169, %4, %cst_68 {dimension_numbers = #tpu.dot_dimension_numbers<[1], [0], [0], [1], [0, 0, 1, 1], [], []>} : vector<4x32xf32>, vector<32x128xf32>, vector<4x128xf32> -> vector<4x128xf32>
      %176 = arith.addf %174, %175 : vector<4x128xf32>
      %177 = vector.extract_strided_slice %176 {offsets = [0, 0], sizes = [4, 32], strides = [1, 1]} : vector<4x128xf32> to vector<4x32xf32>
      %178 = arith.negf %177 : vector<4x32xf32>
      %179 = math.exp %178 : vector<4x32xf32>
      %cst_69 = arith.constant 1.000000e+00 : f32
      %180 = vector.broadcast %cst_69 : f32 to vector<4x32xf32>
      %181 = arith.addf %180, %179 : vector<4x32xf32>
      %182 = arith.divf %180, %181 : vector<4x32xf32>
      %183 = vector.extract_strided_slice %176 {offsets = [0, 32], sizes = [4, 32], strides = [1, 1]} : vector<4x128xf32> to vector<4x32xf32>
      %184 = arith.negf %183 : vector<4x32xf32>
      %185 = math.exp %184 : vector<4x32xf32>
      %cst_70 = arith.constant 1.000000e+00 : f32
      %186 = vector.broadcast %cst_70 : f32 to vector<4x32xf32>
      %187 = arith.addf %186, %185 : vector<4x32xf32>
      %188 = arith.divf %186, %187 : vector<4x32xf32>
      %189 = vector.extract_strided_slice %176 {offsets = [0, 64], sizes = [4, 32], strides = [1, 1]} : vector<4x128xf32> to vector<4x32xf32>
      %190 = math.tanh %189 : vector<4x32xf32>
      %191 = vector.extract_strided_slice %176 {offsets = [0, 96], sizes = [4, 32], strides = [1, 1]} : vector<4x128xf32> to vector<4x32xf32>
      %192 = arith.negf %191 : vector<4x32xf32>
      %193 = math.exp %192 : vector<4x32xf32>
      %cst_71 = arith.constant 1.000000e+00 : f32
      %194 = vector.broadcast %cst_71 : f32 to vector<4x32xf32>
      %195 = arith.addf %194, %193 : vector<4x32xf32>
      %196 = arith.divf %194, %195 : vector<4x32xf32>
      %197 = arith.mulf %188, %167 : vector<4x32xf32>
      %198 = arith.mulf %182, %190 : vector<4x32xf32>
      %199 = arith.addf %197, %198 : vector<4x32xf32>
      %200 = math.tanh %199 : vector<4x32xf32>
      %201 = arith.mulf %196, %200 : vector<4x32xf32>
      %c0_72 = arith.constant 0 : index
      %c5_73 = arith.constant 5 : index
      %c0_74 = arith.constant 0 : index
      %c0_75 = arith.constant 0 : index
      %202 = vector.load %arg4[%c0_72, %c5_73, %c0_74, %c0_75] : memref<1x8x4x32xf32, #tpu.memory_space<vmem>>, vector<1x1x4x32xf32>
      %203 = vector.shape_cast %202 : vector<1x1x4x32xf32> to vector<4x32xf32>
      %204 = vector.shape_cast %201 : vector<4x32xf32> to vector<1x1x4x32xf32>
      tpu.vector_store %arg4[%c0_72, %c5_73, %c0_74, %c0_75], %204 {strides = array<i32>} : memref<1x8x4x32xf32, #tpu.memory_space<vmem>>, vector<1x1x4x32xf32>,
      %c0_76 = arith.constant 0 : index
      %c6 = arith.constant 6 : index
      %c0_77 = arith.constant 0 : index
      %c0_78 = arith.constant 0 : index
      %205 = vector.load %arg2[%c0_76, %c6, %c0_77, %c0_78] : memref<1x8x4x128xf32, #tpu.memory_space<vmem>>, vector<1x1x4x128xf32>
      %206 = vector.shape_cast %205 : vector<1x1x4x128xf32> to vector<4x128xf32>
      %cst_79 = arith.constant dense<0.000000e+00> : vector<4x128xf32>
      %207 = tpu.matmul %201, %4, %cst_79 {dimension_numbers = #tpu.dot_dimension_numbers<[1], [0], [0], [1], [0, 0, 1, 1], [], []>} : vector<4x32xf32>, vector<32x128xf32>, vector<4x128xf32> -> vector<4x128xf32>
      %208 = arith.addf %206, %207 : vector<4x128xf32>
      %209 = vector.extract_strided_slice %208 {offsets = [0, 0], sizes = [4, 32], strides = [1, 1]} : vector<4x128xf32> to vector<4x32xf32>
      %210 = arith.negf %209 : vector<4x32xf32>
      %211 = math.exp %210 : vector<4x32xf32>
      %cst_80 = arith.constant 1.000000e+00 : f32
      %212 = vector.broadcast %cst_80 : f32 to vector<4x32xf32>
      %213 = arith.addf %212, %211 : vector<4x32xf32>
      %214 = arith.divf %212, %213 : vector<4x32xf32>
      %215 = vector.extract_strided_slice %208 {offsets = [0, 32], sizes = [4, 32], strides = [1, 1]} : vector<4x128xf32> to vector<4x32xf32>
      %216 = arith.negf %215 : vector<4x32xf32>
      %217 = math.exp %216 : vector<4x32xf32>
      %cst_81 = arith.constant 1.000000e+00 : f32
      %218 = vector.broadcast %cst_81 : f32 to vector<4x32xf32>
      %219 = arith.addf %218, %217 : vector<4x32xf32>
      %220 = arith.divf %218, %219 : vector<4x32xf32>
      %221 = vector.extract_strided_slice %208 {offsets = [0, 64], sizes = [4, 32], strides = [1, 1]} : vector<4x128xf32> to vector<4x32xf32>
      %222 = math.tanh %221 : vector<4x32xf32>
      %223 = vector.extract_strided_slice %208 {offsets = [0, 96], sizes = [4, 32], strides = [1, 1]} : vector<4x128xf32> to vector<4x32xf32>
      %224 = arith.negf %223 : vector<4x32xf32>
      %225 = math.exp %224 : vector<4x32xf32>
      %cst_82 = arith.constant 1.000000e+00 : f32
      %226 = vector.broadcast %cst_82 : f32 to vector<4x32xf32>
      %227 = arith.addf %226, %225 : vector<4x32xf32>
      %228 = arith.divf %226, %227 : vector<4x32xf32>
      %229 = arith.mulf %220, %199 : vector<4x32xf32>
      %230 = arith.mulf %214, %222 : vector<4x32xf32>
      %231 = arith.addf %229, %230 : vector<4x32xf32>
      %232 = math.tanh %231 : vector<4x32xf32>
      %233 = arith.mulf %228, %232 : vector<4x32xf32>
      %c0_83 = arith.constant 0 : index
      %c6_84 = arith.constant 6 : index
      %c0_85 = arith.constant 0 : index
      %c0_86 = arith.constant 0 : index
      %234 = vector.load %arg4[%c0_83, %c6_84, %c0_85, %c0_86] : memref<1x8x4x32xf32, #tpu.memory_space<vmem>>, vector<1x1x4x32xf32>
      %235 = vector.shape_cast %234 : vector<1x1x4x32xf32> to vector<4x32xf32>
      %236 = vector.shape_cast %233 : vector<4x32xf32> to vector<1x1x4x32xf32>
      tpu.vector_store %arg4[%c0_83, %c6_84, %c0_85, %c0_86], %236 {strides = array<i32>} : memref<1x8x4x32xf32, #tpu.memory_space<vmem>>, vector<1x1x4x32xf32>,
      %c0_87 = arith.constant 0 : index
      %c7 = arith.constant 7 : index
      %c0_88 = arith.constant 0 : index
      %c0_89 = arith.constant 0 : index
      %237 = vector.load %arg2[%c0_87, %c7, %c0_88, %c0_89] : memref<1x8x4x128xf32, #tpu.memory_space<vmem>>, vector<1x1x4x128xf32>
      %238 = vector.shape_cast %237 : vector<1x1x4x128xf32> to vector<4x128xf32>
      %cst_90 = arith.constant dense<0.000000e+00> : vector<4x128xf32>
      %239 = tpu.matmul %233, %4, %cst_90 {dimension_numbers = #tpu.dot_dimension_numbers<[1], [0], [0], [1], [0, 0, 1, 1], [], []>} : vector<4x32xf32>, vector<32x128xf32>, vector<4x128xf32> -> vector<4x128xf32>
      %240 = arith.addf %238, %239 : vector<4x128xf32>
      %241 = vector.extract_strided_slice %240 {offsets = [0, 0], sizes = [4, 32], strides = [1, 1]} : vector<4x128xf32> to vector<4x32xf32>
      %242 = arith.negf %241 : vector<4x32xf32>
      %243 = math.exp %242 : vector<4x32xf32>
      %cst_91 = arith.constant 1.000000e+00 : f32
      %244 = vector.broadcast %cst_91 : f32 to vector<4x32xf32>
      %245 = arith.addf %244, %243 : vector<4x32xf32>
      %246 = arith.divf %244, %245 : vector<4x32xf32>
      %247 = vector.extract_strided_slice %240 {offsets = [0, 32], sizes = [4, 32], strides = [1, 1]} : vector<4x128xf32> to vector<4x32xf32>
      %248 = arith.negf %247 : vector<4x32xf32>
      %249 = math.exp %248 : vector<4x32xf32>
      %cst_92 = arith.constant 1.000000e+00 : f32
      %250 = vector.broadcast %cst_92 : f32 to vector<4x32xf32>
      %251 = arith.addf %250, %249 : vector<4x32xf32>
      %252 = arith.divf %250, %251 : vector<4x32xf32>
      %253 = vector.extract_strided_slice %240 {offsets = [0, 64], sizes = [4, 32], strides = [1, 1]} : vector<4x128xf32> to vector<4x32xf32>
      %254 = math.tanh %253 : vector<4x32xf32>
      %255 = vector.extract_strided_slice %240 {offsets = [0, 96], sizes = [4, 32], strides = [1, 1]} : vector<4x128xf32> to vector<4x32xf32>
      %256 = arith.negf %255 : vector<4x32xf32>
      %257 = math.exp %256 : vector<4x32xf32>
      %cst_93 = arith.constant 1.000000e+00 : f32
      %258 = vector.broadcast %cst_93 : f32 to vector<4x32xf32>
      %259 = arith.addf %258, %257 : vector<4x32xf32>
      %260 = arith.divf %258, %259 : vector<4x32xf32>
      %261 = arith.mulf %252, %231 : vector<4x32xf32>
      %262 = arith.mulf %246, %254 : vector<4x32xf32>
      %263 = arith.addf %261, %262 : vector<4x32xf32>
      %264 = math.tanh %263 : vector<4x32xf32>
      %265 = arith.mulf %260, %264 : vector<4x32xf32>
      %c0_94 = arith.constant 0 : index
      %c7_95 = arith.constant 7 : index
      %c0_96 = arith.constant 0 : index
      %c0_97 = arith.constant 0 : index
      %266 = vector.load %arg4[%c0_94, %c7_95, %c0_96, %c0_97] : memref<1x8x4x32xf32, #tpu.memory_space<vmem>>, vector<1x1x4x32xf32>
      %267 = vector.shape_cast %266 : vector<1x1x4x32xf32> to vector<4x32xf32>
      %268 = vector.shape_cast %265 : vector<4x32xf32> to vector<1x1x4x32xf32>
      tpu.vector_store %arg4[%c0_94, %c7_95, %c0_96, %c0_97], %268 {strides = array<i32>} : memref<1x8x4x32xf32, #tpu.memory_space<vmem>>, vector<1x1x4x32xf32>,
      %c0_98 = arith.constant 0 : index
      %c0_99 = arith.constant 0 : index
      %269 = vector.load %arg5[%c0_98, %c0_99] : memref<4x32xf32, #tpu.memory_space<vmem>>, vector<4x32xf32>
      tpu.vector_store %arg5[%c0_98, %c0_99], %265 {strides = array<i32>} : memref<4x32xf32, #tpu.memory_space<vmem>>, vector<4x32xf32>,
      %c0_100 = arith.constant 0 : index
      %c0_101 = arith.constant 0 : index
      %270 = vector.load %arg6[%c0_100, %c0_101] : memref<4x32xf32, #tpu.memory_space<vmem>>, vector<4x32xf32>
      tpu.vector_store %arg6[%c0_100, %c0_101], %263 {strides = array<i32>} : memref<4x32xf32, #tpu.memory_space<vmem>>, vector<4x32xf32>,
    } else {
    }
    %c1_i32 = arith.constant 1 : i32
    %8 = arith.cmpi eq, %arg0, %c1_i32 : i32
    %9 = arith.extui %8 : i1 to i32
    %c0_i32_5 = arith.constant 0 : i32
    %10 = arith.cmpi ne, %9, %c0_i32_5 : i32
    scf.if %10 {
      %c0_6 = arith.constant 0 : index
      %c0_7 = arith.constant 0 : index
      %11 = vector.load %arg5[%c0_6, %c0_7] : memref<4x32xf32, #tpu.memory_space<vmem>>, vector<4x32xf32>
      %c0_8 = arith.constant 0 : index
      %c0_9 = arith.constant 0 : index
      %12 = vector.load %arg6[%c0_8, %c0_9] : memref<4x32xf32, #tpu.memory_space<vmem>>, vector<4x32xf32>
      %c0_10 = arith.constant 0 : index
      %c7 = arith.constant 7 : index
      %c0_11 = arith.constant 0 : index
      %c0_12 = arith.constant 0 : index
      %13 = vector.load %arg2[%c0_10, %c7, %c0_11, %c0_12] : memref<1x8x4x128xf32, #tpu.memory_space<vmem>>, vector<1x1x4x128xf32>
      %14 = vector.shape_cast %13 : vector<1x1x4x128xf32> to vector<4x128xf32>
      %cst = arith.constant dense<0.000000e+00> : vector<4x128xf32>
      %15 = tpu.matmul %11, %4, %cst {dimension_numbers = #tpu.dot_dimension_numbers<[1], [0], [0], [1], [0, 0, 1, 1], [], []>} : vector<4x32xf32>, vector<32x128xf32>, vector<4x128xf32> -> vector<4x128xf32>
      %16 = arith.addf %14, %15 : vector<4x128xf32>
      %17 = vector.extract_strided_slice %16 {offsets = [0, 0], sizes = [4, 32], strides = [1, 1]} : vector<4x128xf32> to vector<4x32xf32>
      %18 = arith.negf %17 : vector<4x32xf32>
      %19 = math.exp %18 : vector<4x32xf32>
      %cst_13 = arith.constant 1.000000e+00 : f32
      %20 = vector.broadcast %cst_13 : f32 to vector<4x32xf32>
      %21 = arith.addf %20, %19 : vector<4x32xf32>
      %22 = arith.divf %20, %21 : vector<4x32xf32>
      %23 = vector.extract_strided_slice %16 {offsets = [0, 32], sizes = [4, 32], strides = [1, 1]} : vector<4x128xf32> to vector<4x32xf32>
      %24 = arith.negf %23 : vector<4x32xf32>
      %25 = math.exp %24 : vector<4x32xf32>
      %cst_14 = arith.constant 1.000000e+00 : f32
      %26 = vector.broadcast %cst_14 : f32 to vector<4x32xf32>
      %27 = arith.addf %26, %25 : vector<4x32xf32>
      %28 = arith.divf %26, %27 : vector<4x32xf32>
      %29 = vector.extract_strided_slice %16 {offsets = [0, 64], sizes = [4, 32], strides = [1, 1]} : vector<4x128xf32> to vector<4x32xf32>
      %30 = math.tanh %29 : vector<4x32xf32>
      %31 = vector.extract_strided_slice %16 {offsets = [0, 96], sizes = [4, 32], strides = [1, 1]} : vector<4x128xf32> to vector<4x32xf32>
      %32 = arith.negf %31 : vector<4x32xf32>
      %33 = math.exp %32 : vector<4x32xf32>
      %cst_15 = arith.constant 1.000000e+00 : f32
      %34 = vector.broadcast %cst_15 : f32 to vector<4x32xf32>
      %35 = arith.addf %34, %33 : vector<4x32xf32>
      %36 = arith.divf %34, %35 : vector<4x32xf32>
      %37 = arith.mulf %28, %12 : vector<4x32xf32>
      %38 = arith.mulf %22, %30 : vector<4x32xf32>
      %39 = arith.addf %37, %38 : vector<4x32xf32>
      %40 = math.tanh %39 : vector<4x32xf32>
      %41 = arith.mulf %36, %40 : vector<4x32xf32>
      %c0_16 = arith.constant 0 : index
      %c7_17 = arith.constant 7 : index
      %c0_18 = arith.constant 0 : index
      %c0_19 = arith.constant 0 : index
      %42 = vector.load %arg4[%c0_16, %c7_17, %c0_18, %c0_19] : memref<1x8x4x32xf32, #tpu.memory_space<vmem>>, vector<1x1x4x32xf32>
      %43 = vector.shape_cast %42 : vector<1x1x4x32xf32> to vector<4x32xf32>
      %44 = vector.shape_cast %41 : vector<4x32xf32> to vector<1x1x4x32xf32>
      tpu.vector_store %arg4[%c0_16, %c7_17, %c0_18, %c0_19], %44 {strides = array<i32>} : memref<1x8x4x32xf32, #tpu.memory_space<vmem>>, vector<1x1x4x32xf32>,
      %c0_20 = arith.constant 0 : index
      %c6 = arith.constant 6 : index
      %c0_21 = arith.constant 0 : index
      %c0_22 = arith.constant 0 : index
      %45 = vector.load %arg2[%c0_20, %c6, %c0_21, %c0_22] : memref<1x8x4x128xf32, #tpu.memory_space<vmem>>, vector<1x1x4x128xf32>
      %46 = vector.shape_cast %45 : vector<1x1x4x128xf32> to vector<4x128xf32>
      %cst_23 = arith.constant dense<0.000000e+00> : vector<4x128xf32>
      %47 = tpu.matmul %41, %4, %cst_23 {dimension_numbers = #tpu.dot_dimension_numbers<[1], [0], [0], [1], [0, 0, 1, 1], [], []>} : vector<4x32xf32>, vector<32x128xf32>, vector<4x128xf32> -> vector<4x128xf32>
      %48 = arith.addf %46, %47 : vector<4x128xf32>
      %49 = vector.extract_strided_slice %48 {offsets = [0, 0], sizes = [4, 32], strides = [1, 1]} : vector<4x128xf32> to vector<4x32xf32>
      %50 = arith.negf %49 : vector<4x32xf32>
      %51 = math.exp %50 : vector<4x32xf32>
      %cst_24 = arith.constant 1.000000e+00 : f32
      %52 = vector.broadcast %cst_24 : f32 to vector<4x32xf32>
      %53 = arith.addf %52, %51 : vector<4x32xf32>
      %54 = arith.divf %52, %53 : vector<4x32xf32>
      %55 = vector.extract_strided_slice %48 {offsets = [0, 32], sizes = [4, 32], strides = [1, 1]} : vector<4x128xf32> to vector<4x32xf32>
      %56 = arith.negf %55 : vector<4x32xf32>
      %57 = math.exp %56 : vector<4x32xf32>
      %cst_25 = arith.constant 1.000000e+00 : f32
      %58 = vector.broadcast %cst_25 : f32 to vector<4x32xf32>
      %59 = arith.addf %58, %57 : vector<4x32xf32>
      %60 = arith.divf %58, %59 : vector<4x32xf32>
      %61 = vector.extract_strided_slice %48 {offsets = [0, 64], sizes = [4, 32], strides = [1, 1]} : vector<4x128xf32> to vector<4x32xf32>
      %62 = math.tanh %61 : vector<4x32xf32>
      %63 = vector.extract_strided_slice %48 {offsets = [0, 96], sizes = [4, 32], strides = [1, 1]} : vector<4x128xf32> to vector<4x32xf32>
      %64 = arith.negf %63 : vector<4x32xf32>
      %65 = math.exp %64 : vector<4x32xf32>
      %cst_26 = arith.constant 1.000000e+00 : f32
      %66 = vector.broadcast %cst_26 : f32 to vector<4x32xf32>
      %67 = arith.addf %66, %65 : vector<4x32xf32>
      %68 = arith.divf %66, %67 : vector<4x32xf32>
      %69 = arith.mulf %60, %39 : vector<4x32xf32>
      %70 = arith.mulf %54, %62 : vector<4x32xf32>
      %71 = arith.addf %69, %70 : vector<4x32xf32>
      %72 = math.tanh %71 : vector<4x32xf32>
      %73 = arith.mulf %68, %72 : vector<4x32xf32>
      %c0_27 = arith.constant 0 : index
      %c6_28 = arith.constant 6 : index
      %c0_29 = arith.constant 0 : index
      %c0_30 = arith.constant 0 : index
      %74 = vector.load %arg4[%c0_27, %c6_28, %c0_29, %c0_30] : memref<1x8x4x32xf32, #tpu.memory_space<vmem>>, vector<1x1x4x32xf32>
      %75 = vector.shape_cast %74 : vector<1x1x4x32xf32> to vector<4x32xf32>
      %76 = vector.shape_cast %73 : vector<4x32xf32> to vector<1x1x4x32xf32>
      tpu.vector_store %arg4[%c0_27, %c6_28, %c0_29, %c0_30], %76 {strides = array<i32>} : memref<1x8x4x32xf32, #tpu.memory_space<vmem>>, vector<1x1x4x32xf32>,
      %c0_31 = arith.constant 0 : index
      %c5 = arith.constant 5 : index
      %c0_32 = arith.constant 0 : index
      %c0_33 = arith.constant 0 : index
      %77 = vector.load %arg2[%c0_31, %c5, %c0_32, %c0_33] : memref<1x8x4x128xf32, #tpu.memory_space<vmem>>, vector<1x1x4x128xf32>
      %78 = vector.shape_cast %77 : vector<1x1x4x128xf32> to vector<4x128xf32>
      %cst_34 = arith.constant dense<0.000000e+00> : vector<4x128xf32>
      %79 = tpu.matmul %73, %4, %cst_34 {dimension_numbers = #tpu.dot_dimension_numbers<[1], [0], [0], [1], [0, 0, 1, 1], [], []>} : vector<4x32xf32>, vector<32x128xf32>, vector<4x128xf32> -> vector<4x128xf32>
      %80 = arith.addf %78, %79 : vector<4x128xf32>
      %81 = vector.extract_strided_slice %80 {offsets = [0, 0], sizes = [4, 32], strides = [1, 1]} : vector<4x128xf32> to vector<4x32xf32>
      %82 = arith.negf %81 : vector<4x32xf32>
      %83 = math.exp %82 : vector<4x32xf32>
      %cst_35 = arith.constant 1.000000e+00 : f32
      %84 = vector.broadcast %cst_35 : f32 to vector<4x32xf32>
      %85 = arith.addf %84, %83 : vector<4x32xf32>
      %86 = arith.divf %84, %85 : vector<4x32xf32>
      %87 = vector.extract_strided_slice %80 {offsets = [0, 32], sizes = [4, 32], strides = [1, 1]} : vector<4x128xf32> to vector<4x32xf32>
      %88 = arith.negf %87 : vector<4x32xf32>
      %89 = math.exp %88 : vector<4x32xf32>
      %cst_36 = arith.constant 1.000000e+00 : f32
      %90 = vector.broadcast %cst_36 : f32 to vector<4x32xf32>
      %91 = arith.addf %90, %89 : vector<4x32xf32>
      %92 = arith.divf %90, %91 : vector<4x32xf32>
      %93 = vector.extract_strided_slice %80 {offsets = [0, 64], sizes = [4, 32], strides = [1, 1]} : vector<4x128xf32> to vector<4x32xf32>
      %94 = math.tanh %93 : vector<4x32xf32>
      %95 = vector.extract_strided_slice %80 {offsets = [0, 96], sizes = [4, 32], strides = [1, 1]} : vector<4x128xf32> to vector<4x32xf32>
      %96 = arith.negf %95 : vector<4x32xf32>
      %97 = math.exp %96 : vector<4x32xf32>
      %cst_37 = arith.constant 1.000000e+00 : f32
      %98 = vector.broadcast %cst_37 : f32 to vector<4x32xf32>
      %99 = arith.addf %98, %97 : vector<4x32xf32>
      %100 = arith.divf %98, %99 : vector<4x32xf32>
      %101 = arith.mulf %92, %71 : vector<4x32xf32>
      %102 = arith.mulf %86, %94 : vector<4x32xf32>
      %103 = arith.addf %101, %102 : vector<4x32xf32>
      %104 = math.tanh %103 : vector<4x32xf32>
      %105 = arith.mulf %100, %104 : vector<4x32xf32>
      %c0_38 = arith.constant 0 : index
      %c5_39 = arith.constant 5 : index
      %c0_40 = arith.constant 0 : index
      %c0_41 = arith.constant 0 : index
      %106 = vector.load %arg4[%c0_38, %c5_39, %c0_40, %c0_41] : memref<1x8x4x32xf32, #tpu.memory_space<vmem>>, vector<1x1x4x32xf32>
      %107 = vector.shape_cast %106 : vector<1x1x4x32xf32> to vector<4x32xf32>
      %108 = vector.shape_cast %105 : vector<4x32xf32> to vector<1x1x4x32xf32>
      tpu.vector_store %arg4[%c0_38, %c5_39, %c0_40, %c0_41], %108 {strides = array<i32>} : memref<1x8x4x32xf32, #tpu.memory_space<vmem>>, vector<1x1x4x32xf32>,
      %c0_42 = arith.constant 0 : index
      %c4 = arith.constant 4 : index
      %c0_43 = arith.constant 0 : index
      %c0_44 = arith.constant 0 : index
      %109 = vector.load %arg2[%c0_42, %c4, %c0_43, %c0_44] : memref<1x8x4x128xf32, #tpu.memory_space<vmem>>, vector<1x1x4x128xf32>
      %110 = vector.shape_cast %109 : vector<1x1x4x128xf32> to vector<4x128xf32>
      %cst_45 = arith.constant dense<0.000000e+00> : vector<4x128xf32>
      %111 = tpu.matmul %105, %4, %cst_45 {dimension_numbers = #tpu.dot_dimension_numbers<[1], [0], [0], [1], [0, 0, 1, 1], [], []>} : vector<4x32xf32>, vector<32x128xf32>, vector<4x128xf32> -> vector<4x128xf32>
      %112 = arith.addf %110, %111 : vector<4x128xf32>
      %113 = vector.extract_strided_slice %112 {offsets = [0, 0], sizes = [4, 32], strides = [1, 1]} : vector<4x128xf32> to vector<4x32xf32>
      %114 = arith.negf %113 : vector<4x32xf32>
      %115 = math.exp %114 : vector<4x32xf32>
      %cst_46 = arith.constant 1.000000e+00 : f32
      %116 = vector.broadcast %cst_46 : f32 to vector<4x32xf32>
      %117 = arith.addf %116, %115 : vector<4x32xf32>
      %118 = arith.divf %116, %117 : vector<4x32xf32>
      %119 = vector.extract_strided_slice %112 {offsets = [0, 32], sizes = [4, 32], strides = [1, 1]} : vector<4x128xf32> to vector<4x32xf32>
      %120 = arith.negf %119 : vector<4x32xf32>
      %121 = math.exp %120 : vector<4x32xf32>
      %cst_47 = arith.constant 1.000000e+00 : f32
      %122 = vector.broadcast %cst_47 : f32 to vector<4x32xf32>
      %123 = arith.addf %122, %121 : vector<4x32xf32>
      %124 = arith.divf %122, %123 : vector<4x32xf32>
      %125 = vector.extract_strided_slice %112 {offsets = [0, 64], sizes = [4, 32], strides = [1, 1]} : vector<4x128xf32> to vector<4x32xf32>
      %126 = math.tanh %125 : vector<4x32xf32>
      %127 = vector.extract_strided_slice %112 {offsets = [0, 96], sizes = [4, 32], strides = [1, 1]} : vector<4x128xf32> to vector<4x32xf32>
      %128 = arith.negf %127 : vector<4x32xf32>
      %129 = math.exp %128 : vector<4x32xf32>
      %cst_48 = arith.constant 1.000000e+00 : f32
      %130 = vector.broadcast %cst_48 : f32 to vector<4x32xf32>
      %131 = arith.addf %130, %129 : vector<4x32xf32>
      %132 = arith.divf %130, %131 : vector<4x32xf32>
      %133 = arith.mulf %124, %103 : vector<4x32xf32>
      %134 = arith.mulf %118, %126 : vector<4x32xf32>
      %135 = arith.addf %133, %134 : vector<4x32xf32>
      %136 = math.tanh %135 : vector<4x32xf32>
      %137 = arith.mulf %132, %136 : vector<4x32xf32>
      %c0_49 = arith.constant 0 : index
      %c4_50 = arith.constant 4 : index
      %c0_51 = arith.constant 0 : index
      %c0_52 = arith.constant 0 : index
      %138 = vector.load %arg4[%c0_49, %c4_50, %c0_51, %c0_52] : memref<1x8x4x32xf32, #tpu.memory_space<vmem>>, vector<1x1x4x32xf32>
      %139 = vector.shape_cast %138 : vector<1x1x4x32xf32> to vector<4x32xf32>
      %140 = vector.shape_cast %137 : vector<4x32xf32> to vector<1x1x4x32xf32>
      tpu.vector_store %arg4[%c0_49, %c4_50, %c0_51, %c0_52], %140 {strides = array<i32>} : memref<1x8x4x32xf32, #tpu.memory_space<vmem>>, vector<1x1x4x32xf32>,
      %c0_53 = arith.constant 0 : index
      %c3 = arith.constant 3 : index
      %c0_54 = arith.constant 0 : index
      %c0_55 = arith.constant 0 : index
      %141 = vector.load %arg2[%c0_53, %c3, %c0_54, %c0_55] : memref<1x8x4x128xf32, #tpu.memory_space<vmem>>, vector<1x1x4x128xf32>
      %142 = vector.shape_cast %141 : vector<1x1x4x128xf32> to vector<4x128xf32>
      %cst_56 = arith.constant dense<0.000000e+00> : vector<4x128xf32>
      %143 = tpu.matmul %137, %4, %cst_56 {dimension_numbers = #tpu.dot_dimension_numbers<[1], [0], [0], [1], [0, 0, 1, 1], [], []>} : vector<4x32xf32>, vector<32x128xf32>, vector<4x128xf32> -> vector<4x128xf32>
      %144 = arith.addf %142, %143 : vector<4x128xf32>
      %145 = vector.extract_strided_slice %144 {offsets = [0, 0], sizes = [4, 32], strides = [1, 1]} : vector<4x128xf32> to vector<4x32xf32>
      %146 = arith.negf %145 : vector<4x32xf32>
      %147 = math.exp %146 : vector<4x32xf32>
      %cst_57 = arith.constant 1.000000e+00 : f32
      %148 = vector.broadcast %cst_57 : f32 to vector<4x32xf32>
      %149 = arith.addf %148, %147 : vector<4x32xf32>
      %150 = arith.divf %148, %149 : vector<4x32xf32>
      %151 = vector.extract_strided_slice %144 {offsets = [0, 32], sizes = [4, 32], strides = [1, 1]} : vector<4x128xf32> to vector<4x32xf32>
      %152 = arith.negf %151 : vector<4x32xf32>
      %153 = math.exp %152 : vector<4x32xf32>
      %cst_58 = arith.constant 1.000000e+00 : f32
      %154 = vector.broadcast %cst_58 : f32 to vector<4x32xf32>
      %155 = arith.addf %154, %153 : vector<4x32xf32>
      %156 = arith.divf %154, %155 : vector<4x32xf32>
      %157 = vector.extract_strided_slice %144 {offsets = [0, 64], sizes = [4, 32], strides = [1, 1]} : vector<4x128xf32> to vector<4x32xf32>
      %158 = math.tanh %157 : vector<4x32xf32>
      %159 = vector.extract_strided_slice %144 {offsets = [0, 96], sizes = [4, 32], strides = [1, 1]} : vector<4x128xf32> to vector<4x32xf32>
      %160 = arith.negf %159 : vector<4x32xf32>
      %161 = math.exp %160 : vector<4x32xf32>
      %cst_59 = arith.constant 1.000000e+00 : f32
      %162 = vector.broadcast %cst_59 : f32 to vector<4x32xf32>
      %163 = arith.addf %162, %161 : vector<4x32xf32>
      %164 = arith.divf %162, %163 : vector<4x32xf32>
      %165 = arith.mulf %156, %135 : vector<4x32xf32>
      %166 = arith.mulf %150, %158 : vector<4x32xf32>
      %167 = arith.addf %165, %166 : vector<4x32xf32>
      %168 = math.tanh %167 : vector<4x32xf32>
      %169 = arith.mulf %164, %168 : vector<4x32xf32>
      %c0_60 = arith.constant 0 : index
      %c3_61 = arith.constant 3 : index
      %c0_62 = arith.constant 0 : index
      %c0_63 = arith.constant 0 : index
      %170 = vector.load %arg4[%c0_60, %c3_61, %c0_62, %c0_63] : memref<1x8x4x32xf32, #tpu.memory_space<vmem>>, vector<1x1x4x32xf32>
      %171 = vector.shape_cast %170 : vector<1x1x4x32xf32> to vector<4x32xf32>
      %172 = vector.shape_cast %169 : vector<4x32xf32> to vector<1x1x4x32xf32>
      tpu.vector_store %arg4[%c0_60, %c3_61, %c0_62, %c0_63], %172 {strides = array<i32>} : memref<1x8x4x32xf32, #tpu.memory_space<vmem>>, vector<1x1x4x32xf32>,
      %c0_64 = arith.constant 0 : index
      %c2 = arith.constant 2 : index
      %c0_65 = arith.constant 0 : index
      %c0_66 = arith.constant 0 : index
      %173 = vector.load %arg2[%c0_64, %c2, %c0_65, %c0_66] : memref<1x8x4x128xf32, #tpu.memory_space<vmem>>, vector<1x1x4x128xf32>
      %174 = vector.shape_cast %173 : vector<1x1x4x128xf32> to vector<4x128xf32>
      %cst_67 = arith.constant dense<0.000000e+00> : vector<4x128xf32>
      %175 = tpu.matmul %169, %4, %cst_67 {dimension_numbers = #tpu.dot_dimension_numbers<[1], [0], [0], [1], [0, 0, 1, 1], [], []>} : vector<4x32xf32>, vector<32x128xf32>, vector<4x128xf32> -> vector<4x128xf32>
      %176 = arith.addf %174, %175 : vector<4x128xf32>
      %177 = vector.extract_strided_slice %176 {offsets = [0, 0], sizes = [4, 32], strides = [1, 1]} : vector<4x128xf32> to vector<4x32xf32>
      %178 = arith.negf %177 : vector<4x32xf32>
      %179 = math.exp %178 : vector<4x32xf32>
      %cst_68 = arith.constant 1.000000e+00 : f32
      %180 = vector.broadcast %cst_68 : f32 to vector<4x32xf32>
      %181 = arith.addf %180, %179 : vector<4x32xf32>
      %182 = arith.divf %180, %181 : vector<4x32xf32>
      %183 = vector.extract_strided_slice %176 {offsets = [0, 32], sizes = [4, 32], strides = [1, 1]} : vector<4x128xf32> to vector<4x32xf32>
      %184 = arith.negf %183 : vector<4x32xf32>
      %185 = math.exp %184 : vector<4x32xf32>
      %cst_69 = arith.constant 1.000000e+00 : f32
      %186 = vector.broadcast %cst_69 : f32 to vector<4x32xf32>
      %187 = arith.addf %186, %185 : vector<4x32xf32>
      %188 = arith.divf %186, %187 : vector<4x32xf32>
      %189 = vector.extract_strided_slice %176 {offsets = [0, 64], sizes = [4, 32], strides = [1, 1]} : vector<4x128xf32> to vector<4x32xf32>
      %190 = math.tanh %189 : vector<4x32xf32>
      %191 = vector.extract_strided_slice %176 {offsets = [0, 96], sizes = [4, 32], strides = [1, 1]} : vector<4x128xf32> to vector<4x32xf32>
      %192 = arith.negf %191 : vector<4x32xf32>
      %193 = math.exp %192 : vector<4x32xf32>
      %cst_70 = arith.constant 1.000000e+00 : f32
      %194 = vector.broadcast %cst_70 : f32 to vector<4x32xf32>
      %195 = arith.addf %194, %193 : vector<4x32xf32>
      %196 = arith.divf %194, %195 : vector<4x32xf32>
      %197 = arith.mulf %188, %167 : vector<4x32xf32>
      %198 = arith.mulf %182, %190 : vector<4x32xf32>
      %199 = arith.addf %197, %198 : vector<4x32xf32>
      %200 = math.tanh %199 : vector<4x32xf32>
      %201 = arith.mulf %196, %200 : vector<4x32xf32>
      %c0_71 = arith.constant 0 : index
      %c2_72 = arith.constant 2 : index
      %c0_73 = arith.constant 0 : index
      %c0_74 = arith.constant 0 : index
      %202 = vector.load %arg4[%c0_71, %c2_72, %c0_73, %c0_74] : memref<1x8x4x32xf32, #tpu.memory_space<vmem>>, vector<1x1x4x32xf32>
      %203 = vector.shape_cast %202 : vector<1x1x4x32xf32> to vector<4x32xf32>
      %204 = vector.shape_cast %201 : vector<4x32xf32> to vector<1x1x4x32xf32>
      tpu.vector_store %arg4[%c0_71, %c2_72, %c0_73, %c0_74], %204 {strides = array<i32>} : memref<1x8x4x32xf32, #tpu.memory_space<vmem>>, vector<1x1x4x32xf32>,
      %c0_75 = arith.constant 0 : index
      %c1 = arith.constant 1 : index
      %c0_76 = arith.constant 0 : index
      %c0_77 = arith.constant 0 : index
      %205 = vector.load %arg2[%c0_75, %c1, %c0_76, %c0_77] : memref<1x8x4x128xf32, #tpu.memory_space<vmem>>, vector<1x1x4x128xf32>
      %206 = vector.shape_cast %205 : vector<1x1x4x128xf32> to vector<4x128xf32>
      %cst_78 = arith.constant dense<0.000000e+00> : vector<4x128xf32>
      %207 = tpu.matmul %201, %4, %cst_78 {dimension_numbers = #tpu.dot_dimension_numbers<[1], [0], [0], [1], [0, 0, 1, 1], [], []>} : vector<4x32xf32>, vector<32x128xf32>, vector<4x128xf32> -> vector<4x128xf32>
      %208 = arith.addf %206, %207 : vector<4x128xf32>
      %209 = vector.extract_strided_slice %208 {offsets = [0, 0], sizes = [4, 32], strides = [1, 1]} : vector<4x128xf32> to vector<4x32xf32>
      %210 = arith.negf %209 : vector<4x32xf32>
      %211 = math.exp %210 : vector<4x32xf32>
      %cst_79 = arith.constant 1.000000e+00 : f32
      %212 = vector.broadcast %cst_79 : f32 to vector<4x32xf32>
      %213 = arith.addf %212, %211 : vector<4x32xf32>
      %214 = arith.divf %212, %213 : vector<4x32xf32>
      %215 = vector.extract_strided_slice %208 {offsets = [0, 32], sizes = [4, 32], strides = [1, 1]} : vector<4x128xf32> to vector<4x32xf32>
      %216 = arith.negf %215 : vector<4x32xf32>
      %217 = math.exp %216 : vector<4x32xf32>
      %cst_80 = arith.constant 1.000000e+00 : f32
      %218 = vector.broadcast %cst_80 : f32 to vector<4x32xf32>
      %219 = arith.addf %218, %217 : vector<4x32xf32>
      %220 = arith.divf %218, %219 : vector<4x32xf32>
      %221 = vector.extract_strided_slice %208 {offsets = [0, 64], sizes = [4, 32], strides = [1, 1]} : vector<4x128xf32> to vector<4x32xf32>
      %222 = math.tanh %221 : vector<4x32xf32>
      %223 = vector.extract_strided_slice %208 {offsets = [0, 96], sizes = [4, 32], strides = [1, 1]} : vector<4x128xf32> to vector<4x32xf32>
      %224 = arith.negf %223 : vector<4x32xf32>
      %225 = math.exp %224 : vector<4x32xf32>
      %cst_81 = arith.constant 1.000000e+00 : f32
      %226 = vector.broadcast %cst_81 : f32 to vector<4x32xf32>
      %227 = arith.addf %226, %225 : vector<4x32xf32>
      %228 = arith.divf %226, %227 : vector<4x32xf32>
      %229 = arith.mulf %220, %199 : vector<4x32xf32>
      %230 = arith.mulf %214, %222 : vector<4x32xf32>
      %231 = arith.addf %229, %230 : vector<4x32xf32>
      %232 = math.tanh %231 : vector<4x32xf32>
      %233 = arith.mulf %228, %232 : vector<4x32xf32>
      %c0_82 = arith.constant 0 : index
      %c1_83 = arith.constant 1 : index
      %c0_84 = arith.constant 0 : index
      %c0_85 = arith.constant 0 : index
      %234 = vector.load %arg4[%c0_82, %c1_83, %c0_84, %c0_85] : memref<1x8x4x32xf32, #tpu.memory_space<vmem>>, vector<1x1x4x32xf32>
      %235 = vector.shape_cast %234 : vector<1x1x4x32xf32> to vector<4x32xf32>
      %236 = vector.shape_cast %233 : vector<4x32xf32> to vector<1x1x4x32xf32>
      tpu.vector_store %arg4[%c0_82, %c1_83, %c0_84, %c0_85], %236 {strides = array<i32>} : memref<1x8x4x32xf32, #tpu.memory_space<vmem>>, vector<1x1x4x32xf32>,
      %c0_86 = arith.constant 0 : index
      %c0_87 = arith.constant 0 : index
      %c0_88 = arith.constant 0 : index
      %c0_89 = arith.constant 0 : index
      %237 = vector.load %arg2[%c0_86, %c0_87, %c0_88, %c0_89] : memref<1x8x4x128xf32, #tpu.memory_space<vmem>>, vector<1x1x4x128xf32>
      %238 = vector.shape_cast %237 : vector<1x1x4x128xf32> to vector<4x128xf32>
      %cst_90 = arith.constant dense<0.000000e+00> : vector<4x128xf32>
      %239 = tpu.matmul %233, %4, %cst_90 {dimension_numbers = #tpu.dot_dimension_numbers<[1], [0], [0], [1], [0, 0, 1, 1], [], []>} : vector<4x32xf32>, vector<32x128xf32>, vector<4x128xf32> -> vector<4x128xf32>
      %240 = arith.addf %238, %239 : vector<4x128xf32>
      %241 = vector.extract_strided_slice %240 {offsets = [0, 0], sizes = [4, 32], strides = [1, 1]} : vector<4x128xf32> to vector<4x32xf32>
      %242 = arith.negf %241 : vector<4x32xf32>
      %243 = math.exp %242 : vector<4x32xf32>
      %cst_91 = arith.constant 1.000000e+00 : f32
      %244 = vector.broadcast %cst_91 : f32 to vector<4x32xf32>
      %245 = arith.addf %244, %243 : vector<4x32xf32>
      %246 = arith.divf %244, %245 : vector<4x32xf32>
      %247 = vector.extract_strided_slice %240 {offsets = [0, 32], sizes = [4, 32], strides = [1, 1]} : vector<4x128xf32> to vector<4x32xf32>
      %248 = arith.negf %247 : vector<4x32xf32>
      %249 = math.exp %248 : vector<4x32xf32>
      %cst_92 = arith.constant 1.000000e+00 : f32
      %250 = vector.broadcast %cst_92 : f32 to vector<4x32xf32>
      %251 = arith.addf %250, %249 : vector<4x32xf32>
      %252 = arith.divf %250, %251 : vector<4x32xf32>
      %253 = vector.extract_strided_slice %240 {offsets = [0, 64], sizes = [4, 32], strides = [1, 1]} : vector<4x128xf32> to vector<4x32xf32>
      %254 = math.tanh %253 : vector<4x32xf32>
      %255 = vector.extract_strided_slice %240 {offsets = [0, 96], sizes = [4, 32], strides = [1, 1]} : vector<4x128xf32> to vector<4x32xf32>
      %256 = arith.negf %255 : vector<4x32xf32>
      %257 = math.exp %256 : vector<4x32xf32>
      %cst_93 = arith.constant 1.000000e+00 : f32
      %258 = vector.broadcast %cst_93 : f32 to vector<4x32xf32>
      %259 = arith.addf %258, %257 : vector<4x32xf32>
      %260 = arith.divf %258, %259 : vector<4x32xf32>
      %261 = arith.mulf %252, %231 : vector<4x32xf32>
      %262 = arith.mulf %246, %254 : vector<4x32xf32>
      %263 = arith.addf %261, %262 : vector<4x32xf32>
      %264 = math.tanh %263 : vector<4x32xf32>
      %265 = arith.mulf %260, %264 : vector<4x32xf32>
      %c0_94 = arith.constant 0 : index
      %c0_95 = arith.constant 0 : index
      %c0_96 = arith.constant 0 : index
      %c0_97 = arith.constant 0 : index
      %266 = vector.load %arg4[%c0_94, %c0_95, %c0_96, %c0_97] : memref<1x8x4x32xf32, #tpu.memory_space<vmem>>, vector<1x1x4x32xf32>
      %267 = vector.shape_cast %266 : vector<1x1x4x32xf32> to vector<4x32xf32>
      %268 = vector.shape_cast %265 : vector<4x32xf32> to vector<1x1x4x32xf32>
      tpu.vector_store %arg4[%c0_94, %c0_95, %c0_96, %c0_97], %268 {strides = array<i32>} : memref<1x8x4x32xf32, #tpu.memory_space<vmem>>, vector<1x1x4x32xf32>,
      %c0_98 = arith.constant 0 : index
      %c0_99 = arith.constant 0 : index
      %269 = vector.load %arg5[%c0_98, %c0_99] : memref<4x32xf32, #tpu.memory_space<vmem>>, vector<4x32xf32>
      tpu.vector_store %arg5[%c0_98, %c0_99], %265 {strides = array<i32>} : memref<4x32xf32, #tpu.memory_space<vmem>>, vector<4x32xf32>,
      %c0_100 = arith.constant 0 : index
      %c0_101 = arith.constant 0 : index
      %270 = vector.load %arg6[%c0_100, %c0_101] : memref<4x32xf32, #tpu.memory_space<vmem>>, vector<4x32xf32>
      tpu.vector_store %arg6[%c0_100, %c0_101], %263 {strides = array<i32>} : memref<4x32xf32, #tpu.memory_space<vmem>>, vector<4x32xf32>,
    } else {
    }
    return
  }
  func.func @transform_0(%arg0: i32, %arg1: i32) -> (i32, i32, i32, i32) {
    %c0_i32 = arith.constant 0 : i32
    %0 = arith.muli %arg0, %c0_i32 : i32
    %c2_i32 = arith.constant 2 : i32
    %1 = arith.muli %c2_i32, %arg0 : i32
    %c1_i32 = arith.constant 1 : i32
    %2 = arith.subi %c1_i32, %1 : i32
    %3 = arith.muli %2, %arg1 : i32
    %4 = arith.addi %0, %3 : i32
    %c0_i32_0 = arith.constant 0 : i32
    %c0_i32_1 = arith.constant 0 : i32
    %c0_i32_2 = arith.constant 0 : i32
    return %arg0, %4, %c0_i32_0, %c0_i32_1 : i32, i32, i32, i32
  }
  func.func @transform_1(%arg0: i32, %arg1: i32) -> (i32, i32, i32) {
    %c0_i32 = arith.constant 0 : i32
    %c0_i32_0 = arith.constant 0 : i32
    %c0_i32_1 = arith.constant 0 : i32
    return %arg0, %c0_i32, %c0_i32_0 : i32, i32, i32
  }
  func.func @transform_2(%arg0: i32, %arg1: i32) -> (i32, i32, i32, i32) {
    %c0_i32 = arith.constant 0 : i32
    %0 = arith.muli %arg0, %c0_i32 : i32
    %c2_i32 = arith.constant 2 : i32
    %1 = arith.muli %c2_i32, %arg0 : i32
    %c1_i32 = arith.constant 1 : i32
    %2 = arith.subi %c1_i32, %1 : i32
    %3 = arith.muli %2, %arg1 : i32
    %4 = arith.addi %0, %3 : i32
    %c0_i32_0 = arith.constant 0 : i32
    %c0_i32_1 = arith.constant 0 : i32
    %c0_i32_2 = arith.constant 0 : i32
    return %arg0, %4, %c0_i32_0, %c0_i32_1 : i32, i32, i32, i32
  }
}

</mosaic_0001>

<bundles_post_ra>
// kernel: lstm_filter_layer_forward.2
= control target key start
LH: loop header
LB: loop body
LE: loop exit
PB: predicated region body
PF: predicated region fallthrough
CT: control target
= control target key end

     0   :  { %s1769_s9 = smov 0   ;;  %s1771_s10 = smov 0   ;;  %s2023_s0 = inlined_call_operand.vmem [shape: f32[2,8,4,128], index: 0, kind: input, shape index: {}]   ;;  %s2024_s1 = inlined_call_operand.vmem [shape: f32[2,32,128], index: 1, kind: input, shape index: {}]   ;;  %s2025_s2 = inlined_call_operand.vmem [shape: f32[2,8,4,32], index: 2, kind: output, shape index: {}]  }
   0x1   :  { %s1773_s11 = smov 0  }
   0x2 LB: > { %s24_s12 = sadd.s32 1, %s1741_s10  ;;  %p1488_p0 = scmp.ge.s32.totalorder %s1745_s11, 1  ;;  %s1745_s11 = sphi %s1773_s11, %s12_s11   ;;  %s1741_s10 = sphi %s1771_s10, %s2027_s10   ;;  %s1737_s9 = sphi %s1769_s9, %s2026_s9  }
   0x3   : > { %p26_p1 = scmp.ge.s32.totalorder %s24_s12, 2  ;;  %p161_p2 = scmp.lt.s32.totalorder %s1745_s11, 3 }
   0x5   : > { %s2029_s12 = smov (%p26_p1, %s24_s12), 0  ;;  %p162_p3 = pnand %p1488_p0, %p161_p2 }
   0x6   : > { %p206_p4 = scmp.lt.s32.totalorder (!%p162_p3), %s1737_s9, 1  ;;  %p1497_p5 = scmp.ne.s32.totalorder (!%p162_p3), %s1737_s9, 0 }
   0x7   : > { %165 = sbr.rel (%p162_p3) target bundleno = 9291 (0x244b), region = 28 }
   0xc   : > { %vm243_vm0 = vcmask 257024   ;;  %v1747_v0 = vmov 0.0   ;;  %s207_s13 = scalar_select %p206_p4, %s1737_s9, 1 }
   0xd   : > { %244 = vst.msk [vmem:[#allocation2] sm:$0xf] %vm243_vm0, %v1747_v0  ;;  %253 = sbr.rel (%p1497_p5) target bundleno = 4651 (0x122b), region = 36  ;;  %s1748_s24 = smov (!%p1497_p5), 64  }
   0xe   : > { %245 = vst.msk [vmem:[#allocation3] sm:$0xf] %vm243_vm0, %v1747_v0  ;;  %s1561_s14 = sshll.u32 %s207_s13, 5  ;;  %s1749_s25 = smov (!%p1497_p5), 32  }
   0xf   : > { %s1796_s17 = scalar_lea.vmem %s2023_s0, %s1561_s14  ;;  %s222_s20 = scalar_lea.vmem %s2024_s1, %s1561_s14 }
  0x10   : > { %s1804_s23 = scalar_lea.vmem %s2025_s2, %s1561_s14  ;;  %v1806_v1 = vld [vmem:[%s222_s20] sm:$0xff]  ;;  %v1808_v2 = vld [vmem:[%s222_s20 + $0x8] sm:$0xff]  ;;  %v1810_v3 = vld [vmem:[%s222_s20 + $0x10] sm:$0xff]  ;;  %s1750_s26 = smov (!%p1497_p5), 96  }
  0x11   : > { %v1812_v4 = vld [vmem:[%s222_s20 + $0x18] sm:$0xff] }
  0x12   : > { %273 = vmatpush.msra.mxu0 %v1812_v4  ;;  %345 = vmatpush.msra.mxu1 %v1812_v4  ;;  %vm257_vm1 = vcmask 261120   ;;  %v256_v6 = vld [vmem:[%s1796_s17] sm:$0xf]  ;;  %v1500_v34 = vld [vmem:[%s1796_s17 + $0x4] sm:$0xf] }
  0x13   : > { %413 = vmatpush.msra.mxu2 %v1812_v4  ;;  %481 = vmatpush.msra.mxu3 %v1812_v4  ;;  %v1504_v60 = vld [vmem:[%s1796_s17 + $0x8] sm:$0xf] }
  0x14   : > { %274 = vmatpush.msra.mxu0 %v1810_v3  ;;  %346 = vmatpush.msra.mxu1 %v1810_v3  ;;  %v254_v5 = vld [vmem:[#allocation2] sm:$0xf] }
  0x15   : > { %414 = vmatpush.msra.mxu2 %v1810_v3  ;;  %482 = vmatpush.msra.mxu3 %v1810_v3  ;;  %v255_v10 = vld [vmem:[#allocation3] sm:$0xf] }
  0x16   : > { %275 = vmatpush.msra.mxu0 %v1808_v2  ;;  %347 = vmatpush.msra.mxu1 %v1808_v2 }
  0x17   : > { %415 = vmatpush.msra.mxu2 %v1808_v2  ;;  %483 = vmatpush.msra.mxu3 %v1808_v2 }
  0x18   : > { %276 = vmatpush.msra.mxu0 %v1806_v1  ;;  %348 = vmatpush.msra.mxu1 %v1806_v1 }
  0x19   : > { %1498 = vmatmul.msk.f32.vlgmr.msra.gmra.mxu0 %vm257_vm1, %v254_v5  ;;  %416 = vmatpush.msra.mxu2 %v1806_v1 }
  0x1a   : > { %484 = vmatpush.msra.mxu3 %v1806_v1  ;;  %549 = vmatpush.msrb.mxu0 %v1812_v4 }
  0x1b   : > { %617 = vmatpush.msrb.mxu1 %v1812_v4  ;;  %685 = vmatpush.msrb.mxu2 %v1812_v4 }
  0x1c   : > { %550 = vmatpush.msrb.mxu0 %v1810_v3  ;;  %753 = vmatpush.msrb.mxu3 %v1812_v4 }
  0x1d   : > { %618 = vmatpush.msrb.mxu1 %v1810_v3  ;;  %686 = vmatpush.msrb.mxu2 %v1810_v3 }
  0x1e   : > { %551 = vmatpush.msrb.mxu0 %v1808_v2  ;;  %754 = vmatpush.msrb.mxu3 %v1810_v3 }
  0x1f   : > { %619 = vmatpush.msrb.mxu1 %v1808_v2  ;;  %687 = vmatpush.msrb.mxu2 %v1808_v2 }
  0x20   : > { %552 = vmatpush.msrb.mxu0 %v1806_v1  ;;  %755 = vmatpush.msrb.mxu3 %v1808_v2 }
  0x21   : > { %620 = vmatpush.msrb.mxu1 %v1806_v1  ;;  %688 = vmatpush.msrb.mxu2 %v1806_v1 }
  0x22   : > { %756 = vmatpush.msrb.mxu3 %v1806_v1 }
  0x96   : > { %v278_v7 = vpop.f32.mrf.mxu0 }
  0x97   : > { %v281_v8 = vadd.f32 %v278_v7, %v256_v6 }
  0x99   : > { %1595 = vtanh.f32 %v281_v8  ;;  %v1499_v11 = vmul.f32 -1.442695, %v281_v8 }
  0x9b   : > { %1597 = vpow2.f32 %v1499_v11 }
  0x9f   : > { %v1596_v9 = vpop.eup %1595 }
  0xa0   : > { %308 = vrot.lane.b32.xlu0 %v1596_v9, %s1748_s24 }
  0xa1   : > { %v1598_v12 = vpop.eup %1597 }
  0xa2   : > { %v285_v13 = vadd.f32 1.0, %v1598_v12 }
  0xa4   : > { %1599 = vrcp.f32 %v285_v13  ;;  %v297_v19 = vand.u32 2147483648, %v285_v13  ;;  %vm291_vm3 = vweird.f32 %v285_v13  ;;  %v295_v20 = vand.u32 2147483647, %v285_v13 }
  0xa6   : > { %v298_v22 = vor.u32 1.1754944e-38, %v297_v19  ;;  %vm296_vm5 = vcmp.eq.f32.partialorder %v295_v20, 8.507059e+37 }
  0xa8   : > { %303 = vrot.lane.b32.xlu0 %v255_v10, %s1749_s25 }
  0xaa   : > { %v1600_v14 = vpop.eup %1599 }
  0xab   : > { %v287_v15 = vmul.f32 %v1600_v14, %v285_v13  ;;  %vm292_vm2 = vweird.f32 %v1600_v14 }
  0xac   : > { %vm293_vm4 = vmor %vm291_vm3, %vm292_vm2 }
  0xad   : > { %v288_v16 = vsub.f32 1.0, %v287_v15 }
  0xaf   : > { %v289_v17 = vmul.f32 %v1600_v14, %v288_v16 }
  0xb1   : > { %v290_v18 = vadd.f32 %v1600_v14, %v289_v17 }
  0xb3   : > { %v294_v21 = vsel %vm293_vm4, %v1600_v14, %v290_v18 }
  0xb4   : > { %v299_v24 = vsel %vm296_vm5, %v298_v22, %v294_v21 }
 0x112   : > { %v309_v23 = vpop.permute.xlu0 %308 }
 0x113   : > { %v311_v25 = vmul.f32 %v309_v23, %v299_v24 }
 0x115   : > { %313 = vrot.lane.b32.xlu1 %v311_v25, %s1749_s25 }
 0x11a   : > { %v304_v26 = vpop.permute.xlu0 %303 }
 0x11b   : > { %v306_v27 = vmul.f32 %v304_v26, %v299_v24  ;;  %v1508_v26 = vld [vmem:[%s1796_s17 + $0xc] sm:$0xf] }
 0x187   : > { %v314_v28 = vpop.permute.xlu1 %313 }
 0x188   : > { %v316_v29 = vadd.f32 %v314_v28, %v306_v27 }
 0x18a   : > { %1601 = vtanh.f32 %v316_v29 }
 0x190   : > { %v1602_v30 = vpop.eup %1601 }
 0x191   : > { %319 = vrot.lane.b32.xlu1 %v1602_v30, %s1748_s24 }
 0x203   : > { %v320_v31 = vpop.permute.xlu1 %319 }
 0x204   : > { %v322_v32 = vmul.f32 %v320_v31, %v299_v24 }
 0x206   : > { %324 = vrot.lane.b32.xlu2 %v322_v32, %s1749_s25 }
 0x260   : > { %v325_v33 = vpop.permute.xlu2 %324 }
 0x261   : > { %328 = vst.msk [vmem:[%s1804_s23] sm:$0xf] %vm243_vm0, %v325_v33  ;;  %1501 = vmatmul.msk.f32.vlgmr.msra.gmra.mxu1 %vm257_vm1, %v325_v33 }
 0x2de   : > { %v350_v35 = vpop.f32.mrf.mxu1 }
 0x2df   : > { %v353_v36 = vadd.f32 %v1500_v34, %v350_v35 }
 0x2e1   : > { %1603 = vtanh.f32 %v353_v36  ;;  %v1502_v38 = vmul.f32 -1.442695, %v353_v36 }
 0x2e3   : > { %1605 = vpow2.f32 %v1502_v38 }
 0x2e7   : > { %v1604_v37 = vpop.eup %1603 }
 0x2e8   : > { %376 = vrot.lane.b32.xlu2 %v1604_v37, %s1748_s24 }
 0x2e9   : > { %v1606_v39 = vpop.eup %1605 }
 0x2ea   : > { %v357_v40 = vadd.f32 1.0, %v1606_v39 }
 0x2ec   : > { %1607 = vrcp.f32 %v357_v40  ;;  %v369_v46 = vand.u32 2147483648, %v357_v40  ;;  %vm363_vm7 = vweird.f32 %v357_v40  ;;  %v367_v47 = vand.u32 2147483647, %v357_v40 }
 0x2ee   : > { %v370_v49 = vor.u32 1.1754944e-38, %v369_v46  ;;  %vm368_vm9 = vcmp.eq.f32.partialorder %v367_v47, 8.507059e+37 }
 0x2f2   : > { %v1608_v41 = vpop.eup %1607 }
 0x2f3   : > { %v359_v42 = vmul.f32 %v1608_v41, %v357_v40  ;;  %vm364_vm6 = vweird.f32 %v1608_v41 }
 0x2f4   : > { %vm365_vm8 = vmor %vm363_vm7, %vm364_vm6 }
 0x2f5   : > { %v360_v43 = vsub.f32 1.0, %v359_v42 }
 0x2f7   : > { %v361_v44 = vmul.f32 %v1608_v41, %v360_v43 }
 0x2f9   : > { %v362_v45 = vadd.f32 %v1608_v41, %v361_v44 }
 0x2fb   : > { %v366_v48 = vsel %vm365_vm8, %v1608_v41, %v362_v45 }
 0x2fc   : > { %v371_v51 = vsel %vm368_vm9, %v370_v49, %v366_v48 }
 0x2fd   : > { %v374_v53 = vmul.f32 %v371_v51, %v316_v29 }
 0x342   : > { %v377_v50 = vpop.permute.xlu2 %376 }
 0x343   : > { %v379_v52 = vmul.f32 %v377_v50, %v371_v51 }
 0x345   : > { %381 = vrot.lane.b32.xlu0 %v379_v52, %s1749_s25  ;;  %v1512_v52 = vld [vmem:[%s1796_s17 + $0x10] sm:$0xf] }
 0x3b7   : > { %v382_v54 = vpop.permute.xlu0 %381 }
 0x3b8   : > { %v384_v55 = vadd.f32 %v382_v54, %v374_v53 }
 0x3ba   : > { %1609 = vtanh.f32 %v384_v55 }
 0x3c0   : > { %v1610_v56 = vpop.eup %1609 }
 0x3c1   : > { %387 = vrot.lane.b32.xlu1 %v1610_v56, %s1748_s24 }
 0x433   : > { %v388_v57 = vpop.permute.xlu1 %387 }
 0x434   : > { %v390_v58 = vmul.f32 %v388_v57, %v371_v51 }
 0x436   : > { %392 = vrot.lane.b32.xlu2 %v390_v58, %s1749_s25 }
 0x490   : > { %v393_v59 = vpop.permute.xlu2 %392 }
 0x491   : > { %1503 = vst.msk [vmem:[%s1804_s23 + $0x4] sm:$0xf] %vm243_vm0, %v393_v59  ;;  %1505 = vmatmul.msk.f32.vlgmr.msra.gmra.mxu2 %vm257_vm1, %v393_v59 }
 0x514   : > { %v418_v61 = vpop.f32.mrf.mxu2 }
 0x515   : > { %v421_v62 = vadd.f32 %v1504_v60, %v418_v61 }
 0x517   : > { %1611 = vtanh.f32 %v421_v62  ;;  %v1506_v0 = vmul.f32 -1.442695, %v421_v62 }
 0x519   : > { %1613 = vpow2.f32 %v1506_v0 }
 0x51d   : > { %v1612_v63 = vpop.eup %1611 }
 0x51e   : > { %444 = vrot.lane.b32.xlu0 %v1612_v63, %s1748_s24 }
 0x51f   : > { %v1614_v5 = vpop.eup %1613 }
 0x520   : > { %v425_v6 = vadd.f32 1.0, %v1614_v5 }
 0x522   : > { %1615 = vrcp.f32 %v425_v6  ;;  %v437_v12 = vand.u32 2147483648, %v425_v6  ;;  %vm431_vm11 = vweird.f32 %v425_v6  ;;  %v435_v13 = vand.u32 2147483647, %v425_v6 }
 0x524   : > { %v438_v15 = vor.u32 1.1754944e-38, %v437_v12  ;;  %vm436_vm13 = vcmp.eq.f32.partialorder %v435_v13, 8.507059e+37 }
 0x528   : > { %v1616_v7 = vpop.eup %1615 }
 0x529   : > { %v427_v8 = vmul.f32 %v1616_v7, %v425_v6  ;;  %vm432_vm10 = vweird.f32 %v1616_v7 }
 0x52a   : > { %vm433_vm12 = vmor %vm431_vm11, %vm432_vm10 }
 0x52b   : > { %v428_v9 = vsub.f32 1.0, %v427_v8 }
 0x52d   : > { %v429_v10 = vmul.f32 %v1616_v7, %v428_v9 }
 0x52f   : > { %v430_v11 = vadd.f32 %v1616_v7, %v429_v10 }
 0x531   : > { %v434_v14 = vsel %vm433_vm12, %v1616_v7, %v430_v11 }
 0x532   : > { %v439_v17 = vsel %vm436_vm13, %v438_v15, %v434_v14 }
 0x533   : > { %v442_v19 = vmul.f32 %v439_v17, %v384_v55 }
 0x590   : > { %v445_v16 = vpop.permute.xlu0 %444 }
 0x591   : > { %v447_v18 = vmul.f32 %v445_v16, %v439_v17 }
 0x593   : > { %449 = vrot.lane.b32.xlu1 %v447_v18, %s1749_s25  ;;  %v1516_v18 = vld [vmem:[%s1796_s17 + $0x14] sm:$0xf] }
 0x605   : > { %v450_v20 = vpop.permute.xlu1 %449 }
 0x606   : > { %v452_v21 = vadd.f32 %v450_v20, %v442_v19 }
 0x608   : > { %1617 = vtanh.f32 %v452_v21 }
 0x60e   : > { %v1618_v22 = vpop.eup %1617 }
 0x60f   : > { %455 = vrot.lane.b32.xlu2 %v1618_v22, %s1748_s24 }
 0x669   : > { %v456_v23 = vpop.permute.xlu2 %455 }
 0x66a   : > { %v458_v24 = vmul.f32 %v456_v23, %v439_v17 }
 0x66c   : > { %460 = vrot.lane.b32.xlu0 %v458_v24, %s1749_s25 }
 0x6de   : > { %v461_v25 = vpop.permute.xlu0 %460 }
 0x6df   : > { %1507 = vst.msk [vmem:[%s1804_s23 + $0x8] sm:$0xf] %vm243_vm0, %v461_v25  ;;  %1509 = vmatmul.msk.f32.vlgmr.msra.gmra.mxu3 %vm257_vm1, %v461_v25 }
 0x762   : > { %v486_v27 = vpop.f32.mrf.mxu3 }
 0x763   : > { %v489_v28 = vadd.f32 %v1508_v26, %v486_v27 }
 0x765   : > { %1619 = vtanh.f32 %v489_v28  ;;  %v1510_v30 = vmul.f32 -1.442695, %v489_v28 }
 0x767   : > { %1621 = vpow2.f32 %v1510_v30 }
 0x76b   : > { %v1620_v29 = vpop.eup %1619 }
 0x76c   : > { %512 = vrot.lane.b32.xlu1 %v1620_v29, %s1748_s24 }
 0x76d   : > { %v1622_v31 = vpop.eup %1621 }
 0x76e   : > { %v493_v32 = vadd.f32 1.0, %v1622_v31 }
 0x770   : > { %1623 = vrcp.f32 %v493_v32  ;;  %v505_v38 = vand.u32 2147483648, %v493_v32  ;;  %vm499_vm15 = vweird.f32 %v493_v32  ;;  %v503_v39 = vand.u32 2147483647, %v493_v32 }
 0x772   : > { %v506_v41 = vor.u32 1.1754944e-38, %v505_v38  ;;  %vm504_vm3 = vcmp.eq.f32.partialorder %v503_v39, 8.507059e+37 }
 0x776   : > { %v1624_v33 = vpop.eup %1623 }
 0x777   : > { %v495_v34 = vmul.f32 %v1624_v33, %v493_v32  ;;  %vm500_vm14 = vweird.f32 %v1624_v33 }
 0x778   : > { %vm501_vm2 = vmor %vm499_vm15, %vm500_vm14 }
 0x779   : > { %v496_v35 = vsub.f32 1.0, %v495_v34 }
 0x77b   : > { %v497_v36 = vmul.f32 %v1624_v33, %v496_v35 }
 0x77d   : > { %v498_v37 = vadd.f32 %v1624_v33, %v497_v36 }
 0x77f   : > { %v502_v40 = vsel %vm501_vm2, %v1624_v33, %v498_v37 }
 0x780   : > { %v507_v43 = vsel %vm504_vm3, %v506_v41, %v502_v40 }
 0x781   : > { %v510_v45 = vmul.f32 %v507_v43, %v452_v21 }
 0x7de   : > { %v513_v42 = vpop.permute.xlu1 %512 }
 0x7df   : > { %v515_v44 = vmul.f32 %v513_v42, %v507_v43 }
 0x7e1   : > { %517 = vrot.lane.b32.xlu2 %v515_v44, %s1749_s25  ;;  %v1520_v44 = vld [vmem:[%s1796_s17 + $0x18] sm:$0xf] }
 0x83b   : > { %v518_v46 = vpop.permute.xlu2 %517 }
 0x83c   : > { %v520_v47 = vadd.f32 %v518_v46, %v510_v45 }
 0x83e   : > { %1625 = vtanh.f32 %v520_v47 }
 0x844   : > { %v1626_v48 = vpop.eup %1625 }
 0x845   : > { %523 = vrot.lane.b32.xlu0 %v1626_v48, %s1748_s24 }
 0x8b7   : > { %v524_v49 = vpop.permute.xlu0 %523 }
 0x8b8   : > { %v526_v50 = vmul.f32 %v524_v49, %v507_v43 }
 0x8ba   : > { %528 = vrot.lane.b32.xlu1 %v526_v50, %s1749_s25 }
 0x92c   : > { %v529_v51 = vpop.permute.xlu1 %528 }
 0x92d   : > { %1511 = vst.msk [vmem:[%s1804_s23 + $0xc] sm:$0xf] %vm243_vm0, %v529_v51  ;;  %1513 = vmatmul.msk.f32.vlgmr.msrb.gmra.mxu0 %vm257_vm1, %v529_v51 }
 0x9aa   : > { %v554_v53 = vpop.f32.mrf.mxu0 }
 0x9ab   : > { %v557_v54 = vadd.f32 %v1512_v52, %v554_v53 }
 0x9ad   : > { %1627 = vtanh.f32 %v557_v54  ;;  %v1514_v56 = vmul.f32 -1.442695, %v557_v54 }
 0x9af   : > { %1629 = vpow2.f32 %v1514_v56 }
 0x9b3   : > { %v1628_v55 = vpop.eup %1627 }
 0x9b4   : > { %580 = vrot.lane.b32.xlu2 %v1628_v55, %s1748_s24 }
 0x9b5   : > { %v1630_v57 = vpop.eup %1629 }
 0x9b6   : > { %v561_v58 = vadd.f32 1.0, %v1630_v57 }
 0x9b8   : > { %1631 = vrcp.f32 %v561_v58  ;;  %v573_v0 = vand.u32 2147483648, %v561_v58  ;;  %vm567_vm5 = vweird.f32 %v561_v58  ;;  %v571_v5 = vand.u32 2147483647, %v561_v58 }
 0x9ba   : > { %v574_v7 = vor.u32 1.1754944e-38, %v573_v0  ;;  %vm572_vm7 = vcmp.eq.f32.partialorder %v571_v5, 8.507059e+37 }
 0x9be   : > { %v1632_v59 = vpop.eup %1631 }
 0x9bf   : > { %v563_v60 = vmul.f32 %v1632_v59, %v561_v58  ;;  %vm568_vm4 = vweird.f32 %v1632_v59 }
 0x9c0   : > { %vm569_vm6 = vmor %vm567_vm5, %vm568_vm4 }
 0x9c1   : > { %v564_v61 = vsub.f32 1.0, %v563_v60 }
 0x9c3   : > { %v565_v62 = vmul.f32 %v1632_v59, %v564_v61 }
 0x9c5   : > { %v566_v63 = vadd.f32 %v1632_v59, %v565_v62 }
 0x9c7   : > { %v570_v6 = vsel %vm569_vm6, %v1632_v59, %v566_v63 }
 0x9c8   : > { %v575_v9 = vsel %vm572_vm7, %v574_v7, %v570_v6 }
 0x9c9   : > { %v578_v11 = vmul.f32 %v575_v9, %v520_v47 }
 0xa0e   : > { %v581_v8 = vpop.permute.xlu2 %580 }
 0xa0f   : > { %v583_v10 = vmul.f32 %v581_v8, %v575_v9 }
 0xa11   : > { %585 = vrot.lane.b32.xlu0 %v583_v10, %s1749_s25  ;;  %v1524_v10 = vld [vmem:[%s1796_s17 + $0x1c] sm:$0xf] }
 0xa83   : > { %v586_v12 = vpop.permute.xlu0 %585 }
 0xa84   : > { %v588_v13 = vadd.f32 %v586_v12, %v578_v11 }
 0xa86   : > { %1633 = vtanh.f32 %v588_v13 }
 0xa8c   : > { %v1634_v14 = vpop.eup %1633 }
 0xa8d   : > { %591 = vrot.lane.b32.xlu1 %v1634_v14, %s1748_s24 }
 0xaff   : > { %v592_v15 = vpop.permute.xlu1 %591 }
 0xb00   : > { %v594_v16 = vmul.f32 %v592_v15, %v575_v9 }
 0xb02   : > { %596 = vrot.lane.b32.xlu2 %v594_v16, %s1749_s25 }
 0xb5c   : > { %v597_v17 = vpop.permute.xlu2 %596 }
 0xb5d   : > { %1515 = vst.msk [vmem:[%s1804_s23 + $0x10] sm:$0xf] %vm243_vm0, %v597_v17  ;;  %1517 = vmatmul.msk.f32.vlgmr.msrb.gmra.mxu1 %vm257_vm1, %v597_v17 }
 0xbda   : > { %v622_v19 = vpop.f32.mrf.mxu1 }
 0xbdb   : > { %v625_v20 = vadd.f32 %v1516_v18, %v622_v19 }
 0xbdd   : > { %1635 = vtanh.f32 %v625_v20  ;;  %v1518_v22 = vmul.f32 -1.442695, %v625_v20 }
 0xbdf   : > { %1637 = vpow2.f32 %v1518_v22 }
 0xbe3   : > { %v1636_v21 = vpop.eup %1635 }
 0xbe4   : > { %648 = vrot.lane.b32.xlu0 %v1636_v21, %s1748_s24 }
 0xbe5   : > { %v1638_v23 = vpop.eup %1637 }
 0xbe6   : > { %v629_v24 = vadd.f32 1.0, %v1638_v23 }
 0xbe8   : > { %1639 = vrcp.f32 %v629_v24  ;;  %v641_v30 = vand.u32 2147483648, %v629_v24  ;;  %vm635_vm9 = vweird.f32 %v629_v24  ;;  %v639_v31 = vand.u32 2147483647, %v629_v24 }
 0xbea   : > { %v642_v33 = vor.u32 1.1754944e-38, %v641_v30  ;;  %vm640_vm11 = vcmp.eq.f32.partialorder %v639_v31, 8.507059e+37 }
 0xbee   : > { %v1640_v25 = vpop.eup %1639 }
 0xbef   : > { %v631_v26 = vmul.f32 %v1640_v25, %v629_v24  ;;  %vm636_vm8 = vweird.f32 %v1640_v25 }
 0xbf0   : > { %vm637_vm10 = vmor %vm635_vm9, %vm636_vm8 }
 0xbf1   : > { %v632_v27 = vsub.f32 1.0, %v631_v26 }
 0xbf3   : > { %v633_v28 = vmul.f32 %v1640_v25, %v632_v27 }
 0xbf5   : > { %v634_v29 = vadd.f32 %v1640_v25, %v633_v28 }
 0xbf7   : > { %v638_v32 = vsel %vm637_vm10, %v1640_v25, %v634_v29 }
 0xbf8   : > { %v643_v35 = vsel %vm640_vm11, %v642_v33, %v638_v32 }
 0xbf9   : > { %v646_v37 = vmul.f32 %v643_v35, %v588_v13 }
 0xc56   : > { %v649_v34 = vpop.permute.xlu0 %648 }
 0xc57   : > { %v651_v36 = vmul.f32 %v649_v34, %v643_v35 }
 0xc59   : > { %653 = vrot.lane.b32.xlu1 %v651_v36, %s1749_s25 }
 0xccb   : > { %v654_v38 = vpop.permute.xlu1 %653 }
 0xccc   : > { %v656_v39 = vadd.f32 %v654_v38, %v646_v37 }
 0xcce   : > { %1641 = vtanh.f32 %v656_v39 }
 0xcd4   : > { %v1642_v40 = vpop.eup %1641 }
 0xcd5   : > { %659 = vrot.lane.b32.xlu2 %v1642_v40, %s1748_s24 }
 0xd2f   : > { %v660_v41 = vpop.permute.xlu2 %659 }
 0xd30   : > { %v662_v42 = vmul.f32 %v660_v41, %v643_v35 }
 0xd32   : > { %664 = vrot.lane.b32.xlu0 %v662_v42, %s1749_s25 }
 0xda4   : > { %v665_v43 = vpop.permute.xlu0 %664 }
 0xda5   : > { %1519 = vst.msk [vmem:[%s1804_s23 + $0x14] sm:$0xf] %vm243_vm0, %v665_v43  ;;  %1521 = vmatmul.msk.f32.vlgmr.msrb.gmra.mxu2 %vm257_vm1, %v665_v43 }
 0xe28   : > { %v690_v45 = vpop.f32.mrf.mxu2 }
 0xe29   : > { %v693_v46 = vadd.f32 %v1520_v44, %v690_v45 }
 0xe2b   : > { %1643 = vtanh.f32 %v693_v46  ;;  %v1522_v48 = vmul.f32 -1.442695, %v693_v46 }
 0xe2d   : > { %1645 = vpow2.f32 %v1522_v48 }
 0xe31   : > { %v1644_v47 = vpop.eup %1643 }
 0xe32   : > { %716 = vrot.lane.b32.xlu1 %v1644_v47, %s1748_s24 }
 0xe33   : > { %v1646_v49 = vpop.eup %1645 }
 0xe34   : > { %v697_v50 = vadd.f32 1.0, %v1646_v49 }
 0xe36   : > { %1647 = vrcp.f32 %v697_v50  ;;  %v709_v56 = vand.u32 2147483648, %v697_v50  ;;  %vm703_vm13 = vweird.f32 %v697_v50  ;;  %v707_v57 = vand.u32 2147483647, %v697_v50 }
 0xe38   : > { %v710_v59 = vor.u32 1.1754944e-38, %v709_v56  ;;  %vm708_vm15 = vcmp.eq.f32.partialorder %v707_v57, 8.507059e+37 }
 0xe3c   : > { %v1648_v51 = vpop.eup %1647 }
 0xe3d   : > { %v699_v52 = vmul.f32 %v1648_v51, %v697_v50  ;;  %vm704_vm12 = vweird.f32 %v1648_v51 }
 0xe3e   : > { %vm705_vm14 = vmor %vm703_vm13, %vm704_vm12 }
 0xe3f   : > { %v700_v53 = vsub.f32 1.0, %v699_v52 }
 0xe41   : > { %v701_v54 = vmul.f32 %v1648_v51, %v700_v53 }
 0xe43   : > { %v702_v55 = vadd.f32 %v1648_v51, %v701_v54 }
 0xe45   : > { %v706_v58 = vsel %vm705_vm14, %v1648_v51, %v702_v55 }
 0xe46   : > { %v711_v61 = vsel %vm708_vm15, %v710_v59, %v706_v58 }
 0xe47   : > { %v714_v63 = vmul.f32 %v711_v61, %v656_v39 }
 0xea4   : > { %v717_v60 = vpop.permute.xlu1 %716 }
 0xea5   : > { %v719_v62 = vmul.f32 %v717_v60, %v711_v61 }
 0xea7   : > { %721 = vrot.lane.b32.xlu2 %v719_v62, %s1749_s25 }
 0xf01   : > { %v722_v0 = vpop.permute.xlu2 %721 }
 0xf02   : > { %v724_v5 = vadd.f32 %v722_v0, %v714_v63 }
 0xf04   : > { %1649 = vtanh.f32 %v724_v5 }
 0xf0a   : > { %v1650_v6 = vpop.eup %1649 }
 0xf0b   : > { %727 = vrot.lane.b32.xlu0 %v1650_v6, %s1748_s24 }
 0xf7d   : > { %v728_v7 = vpop.permute.xlu0 %727 }
 0xf7e   : > { %v730_v8 = vmul.f32 %v728_v7, %v711_v61 }
 0xf80   : > { %732 = vrot.lane.b32.xlu1 %v730_v8, %s1749_s25 }
 0xff2   : > { %v733_v9 = vpop.permute.xlu1 %732 }
 0xff3   : > { %1523 = vst.msk [vmem:[%s1804_s23 + $0x18] sm:$0xf] %vm243_vm0, %v733_v9  ;;  %1525 = vmatmul.msk.f32.vlgmr.msrb.gmra.mxu3 %vm257_vm1, %v733_v9 }
0x1076   : > { %v758_v11 = vpop.f32.mrf.mxu3 }
0x1077   : > { %v761_v12 = vadd.f32 %v1524_v10, %v758_v11 }
0x1079   : > { %1651 = vtanh.f32 %v761_v12  ;;  %v1526_v14 = vmul.f32 -1.442695, %v761_v12 }
0x107b   : > { %1653 = vpow2.f32 %v1526_v14 }
0x107f   : > { %v1652_v13 = vpop.eup %1651 }
0x1080   : > { %784 = vrot.lane.b32.xlu2 %v1652_v13, %s1748_s24 }
0x1081   : > { %v1654_v15 = vpop.eup %1653 }
0x1082   : > { %v765_v16 = vadd.f32 1.0, %v1654_v15 }
0x1084   : > { %1655 = vrcp.f32 %v765_v16  ;;  %v777_v22 = vand.u32 2147483648, %v765_v16  ;;  %vm771_vm1 = vweird.f32 %v765_v16  ;;  %v775_v23 = vand.u32 2147483647, %v765_v16 }
0x1086   : > { %v778_v25 = vor.u32 1.1754944e-38, %v777_v22  ;;  %vm776_vm4 = vcmp.eq.f32.partialorder %v775_v23, 8.507059e+37 }
0x108a   : > { %v1656_v17 = vpop.eup %1655 }
0x108b   : > { %v767_v18 = vmul.f32 %v1656_v17, %v765_v16  ;;  %vm772_vm2 = vweird.f32 %v1656_v17 }
0x108c   : > { %vm773_vm3 = vmor %vm771_vm1, %vm772_vm2 }
0x108d   : > { %v768_v19 = vsub.f32 1.0, %v767_v18 }
0x108f   : > { %v769_v20 = vmul.f32 %v1656_v17, %v768_v19 }
0x1091   : > { %v770_v21 = vadd.f32 %v1656_v17, %v769_v20 }
0x1093   : > { %v774_v24 = vsel %vm773_vm3, %v1656_v17, %v770_v21 }
0x1094   : > { %v779_v27 = vsel %vm776_vm4, %v778_v25, %v774_v24 }
0x1095   : > { %v782_v29 = vmul.f32 %v779_v27, %v724_v5 }
0x10da   : > { %v785_v26 = vpop.permute.xlu2 %784 }
0x10db   : > { %v787_v28 = vmul.f32 %v785_v26, %v779_v27 }
0x10dd   : > { %789 = vrot.lane.b32.xlu0 %v787_v28, %s1749_s25 }
0x114f   : > { %v790_v30 = vpop.permute.xlu0 %789 }
0x1150   : > { %v792_v31 = vadd.f32 %v790_v30, %v782_v29 }
0x1152   : > { %1657 = vtanh.f32 %v792_v31  ;;  %807 = vrot.lane.b32.xlu0 %v792_v31, %s1750_s26 }
0x1158   : > { %v1658_v32 = vpop.eup %1657 }
0x1159   : > { %795 = vrot.lane.b32.xlu1 %v1658_v32, %s1748_s24 }
0x11c4   : > { %v808_v33 = vpop.permute.xlu0 %807 }
0x11c5   : > { %810 = vst.msk [vmem:[#allocation3] sm:$0xf] %vm243_vm0, %v808_v33 }
0x11cb   : > { %v796_v34 = vpop.permute.xlu1 %795 }
0x11cc   : > { %v798_v35 = vmul.f32 %v796_v34, %v779_v27 }
0x11ce   : > { %800 = vrot.lane.b32.xlu2 %v798_v35, %s1749_s25 }
0x1228   : > { %v801_v36 = vpop.permute.xlu2 %800 }
0x1229   : > { %1527 = vst.msk [vmem:[%s1804_s23 + $0x1c] sm:$0xf] %vm243_vm0, %v801_v36 }
0x122a   : > { %805 = vst.msk [vmem:[#allocation2] sm:$0xf] %vm243_vm0, %v801_v36 }
0x122b PF: > { %p1528_p6 = scmp.ne.s32.totalorder %s1737_s9, 1 }
0x122c   : > { %s1751_s27 = smov (!%p1528_p6), 64   ;;  %s1752_s28 = smov (!%p1528_p6), 32  }
0x122d   : > { %814 = sbr.rel (%p1528_p6) target bundleno = 9291 (0x244b), region = 40  ;;  %s1753_s29 = smov (!%p1528_p6), 96  }
0x1232   : > { %835 = vmatpush.msra.mxu0 %v1812_v4  ;;  %908 = vmatpush.msra.mxu1 %v1812_v4  ;;  %v815_v37 = vld [vmem:[#allocation2] sm:$0xf]  ;;  %vm819_vm5 = vcmask 261120   ;;  %v1533_v62 = vld [vmem:[%s1796_s17 + $0x18] sm:$0xf] }
0x1233   : > { %976 = vmatpush.msra.mxu2 %v1812_v4  ;;  %1044 = vmatpush.msra.mxu3 %v1812_v4  ;;  %v1537_v28 = vld [vmem:[%s1796_s17 + $0x14] sm:$0xf] }
0x1234   : > { %836 = vmatpush.msra.mxu0 %v1810_v3  ;;  %909 = vmatpush.msra.mxu1 %v1810_v3 }
0x1235   : > { %977 = vmatpush.msra.mxu2 %v1810_v3  ;;  %1045 = vmatpush.msra.mxu3 %v1810_v3 }
0x1236   : > { %837 = vmatpush.msra.mxu0 %v1808_v2  ;;  %910 = vmatpush.msra.mxu1 %v1808_v2 }
0x1237   : > { %978 = vmatpush.msra.mxu2 %v1808_v2  ;;  %1046 = vmatpush.msra.mxu3 %v1808_v2 }
0x1238   : > { %838 = vmatpush.msra.mxu0 %v1806_v1  ;;  %911 = vmatpush.msra.mxu1 %v1806_v1 }
0x1239   : > { %1530 = vmatmul.msk.f32.vlgmr.msra.gmra.mxu0 %vm819_vm5, %v815_v37  ;;  %979 = vmatpush.msra.mxu2 %v1806_v1 }
0x123a   : > { %1047 = vmatpush.msra.mxu3 %v1806_v1  ;;  %1112 = vmatpush.msrb.mxu0 %v1812_v4 }
0x123b   : > { %1180 = vmatpush.msrb.mxu1 %v1812_v4  ;;  %1248 = vmatpush.msrb.mxu2 %v1812_v4 }
0x123c   : > { %1113 = vmatpush.msrb.mxu0 %v1810_v3  ;;  %1315 = vmatpush.msrb.mxu3 %v1812_v4  ;;  %v1529_v4 = vld [vmem:[%s1796_s17 + $0x1c] sm:$0xf] }
0x123d   : > { %1181 = vmatpush.msrb.mxu1 %v1810_v3  ;;  %1249 = vmatpush.msrb.mxu2 %v1810_v3 }
0x123e   : > { %1114 = vmatpush.msrb.mxu0 %v1808_v2  ;;  %1316 = vmatpush.msrb.mxu3 %v1810_v3  ;;  %v816_v3 = vld [vmem:[#allocation3] sm:$0xf] }
0x123f   : > { %1182 = vmatpush.msrb.mxu1 %v1808_v2  ;;  %1250 = vmatpush.msrb.mxu2 %v1808_v2 }
0x1240   : > { %1115 = vmatpush.msrb.mxu0 %v1806_v1  ;;  %1317 = vmatpush.msrb.mxu3 %v1808_v2 }
0x1241   : > { %1183 = vmatpush.msrb.mxu1 %v1806_v1  ;;  %1251 = vmatpush.msrb.mxu2 %v1806_v1 }
0x1242   : > { %1318 = vmatpush.msrb.mxu3 %v1806_v1 }
0x12b6   : > { %v840_v38 = vpop.f32.mrf.mxu0 }
0x12b7   : > { %v843_v39 = vadd.f32 %v1529_v4, %v840_v38 }
0x12b9   : > { %1659 = vtanh.f32 %v843_v39  ;;  %v1531_v41 = vmul.f32 -1.442695, %v843_v39 }
0x12bb   : > { %1661 = vpow2.f32 %v1531_v41 }
0x12bf   : > { %v1660_v40 = vpop.eup %1659 }
0x12c0   : > { %870 = vrot.lane.b32.xlu0 %v1660_v40, %s1751_s27 }
0x12c1   : > { %v1662_v2 = vpop.eup %1661 }
0x12c2   : > { %v847_v42 = vadd.f32 1.0, %v1662_v2 }
0x12c4   : > { %1663 = vrcp.f32 %v847_v42  ;;  %v859_v47 = vand.u32 2147483648, %v847_v42  ;;  %vm853_vm7 = vweird.f32 %v847_v42  ;;  %v857_v48 = vand.u32 2147483647, %v847_v42 }
0x12c6   : > { %v860_v50 = vor.u32 1.1754944e-38, %v859_v47  ;;  %vm858_vm9 = vcmp.eq.f32.partialorder %v857_v48, 8.507059e+37 }
0x12c8   : > { %865 = vrot.lane.b32.xlu0 %v816_v3, %s1752_s28 }
0x12ca   : > { %v1664_v43 = vpop.eup %1663 }
0x12cb   : > { %v849_v44 = vmul.f32 %v1664_v43, %v847_v42  ;;  %vm854_vm6 = vweird.f32 %v1664_v43 }
0x12cc   : > { %vm855_vm8 = vmor %vm853_vm7, %vm854_vm6 }
0x12cd   : > { %v850_v1 = vsub.f32 1.0, %v849_v44 }
0x12cf   : > { %v851_v45 = vmul.f32 %v1664_v43, %v850_v1 }
0x12d1   : > { %v852_v46 = vadd.f32 %v1664_v43, %v851_v45 }
0x12d3   : > { %v856_v49 = vsel %vm855_vm8, %v1664_v43, %v852_v46 }
0x12d4   : > { %v861_v52 = vsel %vm858_vm9, %v860_v50, %v856_v49  ;;  %v1541_v50 = vld [vmem:[%s1796_s17 + $0x10] sm:$0xf] }
0x1332   : > { %v871_v51 = vpop.permute.xlu0 %870 }
0x1333   : > { %v873_v53 = vmul.f32 %v871_v51, %v861_v52 }
0x1335   : > { %875 = vrot.lane.b32.xlu1 %v873_v53, %s1752_s28 }
0x133a   : > { %v866_v54 = vpop.permute.xlu0 %865 }
0x133b   : > { %v868_v55 = vmul.f32 %v866_v54, %v861_v52 }
0x13a7   : > { %v876_v56 = vpop.permute.xlu1 %875 }
0x13a8   : > { %v878_v57 = vadd.f32 %v876_v56, %v868_v55 }
0x13aa   : > { %1665 = vtanh.f32 %v878_v57 }
0x13b0   : > { %v1666_v58 = vpop.eup %1665 }
0x13b1   : > { %881 = vrot.lane.b32.xlu1 %v1666_v58, %s1751_s27 }
0x1423   : > { %v882_v59 = vpop.permute.xlu1 %881 }
0x1424   : > { %v884_v60 = vmul.f32 %v882_v59, %v861_v52 }
0x1426   : > { %886 = vrot.lane.b32.xlu2 %v884_v60, %s1752_s28 }
0x1480   : > { %v887_v61 = vpop.permute.xlu2 %886 }
0x1481   : > { %1532 = vst.msk [vmem:[%s1804_s23 + $0x1c] sm:$0xf] %vm243_vm0, %v887_v61  ;;  %1534 = vmatmul.msk.f32.vlgmr.msra.gmra.mxu1 %vm819_vm5, %v887_v61 }
0x14fe   : > { %v913_v63 = vpop.f32.mrf.mxu1 }
0x14ff   : > { %v916_v0 = vadd.f32 %v1533_v62, %v913_v63 }
0x1501   : > { %1667 = vtanh.f32 %v916_v0  ;;  %v1535_v6 = vmul.f32 -1.442695, %v916_v0 }
0x1503   : > { %1669 = vpow2.f32 %v1535_v6 }
0x1507   : > { %v1668_v5 = vpop.eup %1667 }
0x1508   : > { %939 = vrot.lane.b32.xlu2 %v1668_v5, %s1751_s27 }
0x1509   : > { %v1670_v7 = vpop.eup %1669 }
0x150a   : > { %v920_v8 = vadd.f32 1.0, %v1670_v7 }
0x150c   : > { %1671 = vrcp.f32 %v920_v8  ;;  %v932_v14 = vand.u32 2147483648, %v920_v8  ;;  %vm926_vm11 = vweird.f32 %v920_v8  ;;  %v930_v15 = vand.u32 2147483647, %v920_v8 }
0x150e   : > { %v933_v17 = vor.u32 1.1754944e-38, %v932_v14  ;;  %vm931_vm13 = vcmp.eq.f32.partialorder %v930_v15, 8.507059e+37 }
0x1512   : > { %v1672_v9 = vpop.eup %1671 }
0x1513   : > { %v922_v10 = vmul.f32 %v1672_v9, %v920_v8  ;;  %vm927_vm10 = vweird.f32 %v1672_v9 }
0x1514   : > { %vm928_vm12 = vmor %vm926_vm11, %vm927_vm10 }
0x1515   : > { %v923_v11 = vsub.f32 1.0, %v922_v10 }
0x1517   : > { %v924_v12 = vmul.f32 %v1672_v9, %v923_v11 }
0x1519   : > { %v925_v13 = vadd.f32 %v1672_v9, %v924_v12 }
0x151b   : > { %v929_v16 = vsel %vm928_vm12, %v1672_v9, %v925_v13 }
0x151c   : > { %v934_v19 = vsel %vm931_vm13, %v933_v17, %v929_v16  ;;  %v1545_v16 = vld [vmem:[%s1796_s17 + $0xc] sm:$0xf] }
0x151d   : > { %v937_v21 = vmul.f32 %v934_v19, %v878_v57 }
0x1562   : > { %v940_v18 = vpop.permute.xlu2 %939 }
0x1563   : > { %v942_v20 = vmul.f32 %v940_v18, %v934_v19 }
0x1565   : > { %944 = vrot.lane.b32.xlu0 %v942_v20, %s1752_s28 }
0x15d7   : > { %v945_v22 = vpop.permute.xlu0 %944 }
0x15d8   : > { %v947_v23 = vadd.f32 %v945_v22, %v937_v21 }
0x15da   : > { %1673 = vtanh.f32 %v947_v23 }
0x15e0   : > { %v1674_v24 = vpop.eup %1673 }
0x15e1   : > { %950 = vrot.lane.b32.xlu1 %v1674_v24, %s1751_s27 }
0x1653   : > { %v951_v25 = vpop.permute.xlu1 %950 }
0x1654   : > { %v953_v26 = vmul.f32 %v951_v25, %v934_v19 }
0x1656   : > { %955 = vrot.lane.b32.xlu2 %v953_v26, %s1752_s28 }
0x16b0   : > { %v956_v27 = vpop.permute.xlu2 %955 }
0x16b1   : > { %1536 = vst.msk [vmem:[%s1804_s23 + $0x18] sm:$0xf] %vm243_vm0, %v956_v27  ;;  %1538 = vmatmul.msk.f32.vlgmr.msra.gmra.mxu2 %vm819_vm5, %v956_v27 }
0x1734   : > { %v981_v29 = vpop.f32.mrf.mxu2 }
0x1735   : > { %v984_v30 = vadd.f32 %v1537_v28, %v981_v29 }
0x1737   : > { %1675 = vtanh.f32 %v984_v30  ;;  %v1539_v32 = vmul.f32 -1.442695, %v984_v30 }
0x1739   : > { %1677 = vpow2.f32 %v1539_v32 }
0x173d   : > { %v1676_v31 = vpop.eup %1675 }
0x173e   : > { %1007 = vrot.lane.b32.xlu0 %v1676_v31, %s1751_s27 }
0x173f   : > { %v1678_v33 = vpop.eup %1677 }
0x1740   : > { %v988_v34 = vadd.f32 1.0, %v1678_v33 }
0x1742   : > { %1679 = vrcp.f32 %v988_v34  ;;  %v1000_v39 = vand.u32 2147483648, %v988_v34  ;;  %vm994_vm15 = vweird.f32 %v988_v34  ;;  %v998_v40 = vand.u32 2147483647, %v988_v34 }
0x1744   : > { %v1001_v41 = vor.u32 1.1754944e-38, %v1000_v39  ;;  %vm999_vm1 = vcmp.eq.f32.partialorder %v998_v40, 8.507059e+37 }
0x1748   : > { %v1680_v35 = vpop.eup %1679 }
0x1749   : > { %v990_v36 = vmul.f32 %v1680_v35, %v988_v34  ;;  %vm995_vm14 = vweird.f32 %v1680_v35 }
0x174a   : > { %vm996_vm2 = vmor %vm994_vm15, %vm995_vm14 }
0x174b   : > { %v991_v37 = vsub.f32 1.0, %v990_v36 }
0x174d   : > { %v992_v4 = vmul.f32 %v1680_v35, %v991_v37 }
0x174f   : > { %v993_v38 = vadd.f32 %v1680_v35, %v992_v4 }
0x1751   : > { %v997_v3 = vsel %vm996_vm2, %v1680_v35, %v993_v38 }
0x1752   : > { %v1002_v42 = vsel %vm999_vm1, %v1001_v41, %v997_v3  ;;  %v1549_v3 = vld [vmem:[%s1796_s17 + $0x8] sm:$0xf] }
0x1753   : > { %v1005_v44 = vmul.f32 %v1002_v42, %v947_v23 }
0x17b0   : > { %v1008_v2 = vpop.permute.xlu0 %1007 }
0x17b1   : > { %v1010_v43 = vmul.f32 %v1008_v2, %v1002_v42 }
0x17b3   : > { %1012 = vrot.lane.b32.xlu1 %v1010_v43, %s1752_s28 }
0x1825   : > { %v1013_v1 = vpop.permute.xlu1 %1012 }
0x1826   : > { %v1015_v45 = vadd.f32 %v1013_v1, %v1005_v44 }
0x1828   : > { %1681 = vtanh.f32 %v1015_v45 }
0x182e   : > { %v1682_v46 = vpop.eup %1681 }
0x182f   : > { %1018 = vrot.lane.b32.xlu2 %v1682_v46, %s1751_s27 }
0x1889   : > { %v1019_v47 = vpop.permute.xlu2 %1018 }
0x188a   : > { %v1021_v48 = vmul.f32 %v1019_v47, %v1002_v42 }
0x188c   : > { %1023 = vrot.lane.b32.xlu0 %v1021_v48, %s1752_s28 }
0x18fe   : > { %v1024_v49 = vpop.permute.xlu0 %1023 }
0x18ff   : > { %1540 = vst.msk [vmem:[%s1804_s23 + $0x14] sm:$0xf] %vm243_vm0, %v1024_v49  ;;  %1542 = vmatmul.msk.f32.vlgmr.msra.gmra.mxu3 %vm819_vm5, %v1024_v49 }
0x1982   : > { %v1049_v51 = vpop.f32.mrf.mxu3 }
0x1983   : > { %v1052_v52 = vadd.f32 %v1541_v50, %v1049_v51 }
0x1985   : > { %1683 = vtanh.f32 %v1052_v52  ;;  %v1543_v54 = vmul.f32 -1.442695, %v1052_v52 }
0x1987   : > { %1685 = vpow2.f32 %v1543_v54 }
0x198b   : > { %v1684_v53 = vpop.eup %1683 }
0x198c   : > { %1075 = vrot.lane.b32.xlu1 %v1684_v53, %s1751_s27 }
0x198d   : > { %v1686_v55 = vpop.eup %1685 }
0x198e   : > { %v1056_v56 = vadd.f32 1.0, %v1686_v55 }
0x1990   : > { %1687 = vrcp.f32 %v1056_v56  ;;  %v1068_v62 = vand.u32 2147483648, %v1056_v56  ;;  %vm1062_vm4 = vweird.f32 %v1056_v56  ;;  %v1066_v63 = vand.u32 2147483647, %v1056_v56 }
0x1992   : > { %v1069_v5 = vor.u32 1.1754944e-38, %v1068_v62  ;;  %vm1067_vm7 = vcmp.eq.f32.partialorder %v1066_v63, 8.507059e+37 }
0x1996   : > { %v1688_v57 = vpop.eup %1687 }
0x1997   : > { %v1058_v58 = vmul.f32 %v1688_v57, %v1056_v56  ;;  %vm1063_vm3 = vweird.f32 %v1688_v57 }
0x1998   : > { %vm1064_vm6 = vmor %vm1062_vm4, %vm1063_vm3 }
0x1999   : > { %v1059_v59 = vsub.f32 1.0, %v1058_v58 }
0x199b   : > { %v1060_v60 = vmul.f32 %v1688_v57, %v1059_v59 }
0x199d   : > { %v1061_v61 = vadd.f32 %v1688_v57, %v1060_v60 }
0x199f   : > { %v1065_v0 = vsel %vm1064_vm6, %v1688_v57, %v1061_v61 }
0x19a0   : > { %v1070_v7 = vsel %vm1067_vm7, %v1069_v5, %v1065_v0  ;;  %v1553_v0 = vld [vmem:[%s1796_s17 + $0x4] sm:$0xf] }
0x19a1   : > { %v1073_v9 = vmul.f32 %v1070_v7, %v1015_v45 }
0x19fe   : > { %v1076_v6 = vpop.permute.xlu1 %1075 }
0x19ff   : > { %v1078_v8 = vmul.f32 %v1076_v6, %v1070_v7 }
0x1a01   : > { %1080 = vrot.lane.b32.xlu2 %v1078_v8, %s1752_s28 }
0x1a5b   : > { %v1081_v10 = vpop.permute.xlu2 %1080 }
0x1a5c   : > { %v1083_v11 = vadd.f32 %v1081_v10, %v1073_v9 }
0x1a5e   : > { %1689 = vtanh.f32 %v1083_v11 }
0x1a64   : > { %v1690_v12 = vpop.eup %1689 }
0x1a65   : > { %1086 = vrot.lane.b32.xlu0 %v1690_v12, %s1751_s27 }
0x1ad7   : > { %v1087_v13 = vpop.permute.xlu0 %1086 }
0x1ad8   : > { %v1089_v14 = vmul.f32 %v1087_v13, %v1070_v7 }
0x1ada   : > { %1091 = vrot.lane.b32.xlu1 %v1089_v14, %s1752_s28 }
0x1b4c   : > { %v1092_v15 = vpop.permute.xlu1 %1091 }
0x1b4d   : > { %1544 = vst.msk [vmem:[%s1804_s23 + $0x10] sm:$0xf] %vm243_vm0, %v1092_v15  ;;  %1546 = vmatmul.msk.f32.vlgmr.msrb.gmra.mxu0 %vm819_vm5, %v1092_v15 }
0x1bca   : > { %v1117_v17 = vpop.f32.mrf.mxu0 }
0x1bcb   : > { %v1120_v18 = vadd.f32 %v1545_v16, %v1117_v17 }
0x1bcd   : > { %1691 = vtanh.f32 %v1120_v18  ;;  %v1547_v20 = vmul.f32 -1.442695, %v1120_v18 }
0x1bcf   : > { %1693 = vpow2.f32 %v1547_v20 }
0x1bd3   : > { %v1692_v19 = vpop.eup %1691 }
0x1bd4   : > { %1143 = vrot.lane.b32.xlu2 %v1692_v19, %s1751_s27 }
0x1bd5   : > { %v1694_v21 = vpop.eup %1693 }
0x1bd6   : > { %v1124_v22 = vadd.f32 1.0, %v1694_v21 }
0x1bd8   : > { %1695 = vrcp.f32 %v1124_v22  ;;  %v1136_v28 = vand.u32 2147483648, %v1124_v22  ;;  %vm1130_vm9 = vweird.f32 %v1124_v22  ;;  %v1134_v29 = vand.u32 2147483647, %v1124_v22 }
0x1bda   : > { %v1137_v31 = vor.u32 1.1754944e-38, %v1136_v28  ;;  %vm1135_vm11 = vcmp.eq.f32.partialorder %v1134_v29, 8.507059e+37 }
0x1bde   : > { %v1696_v23 = vpop.eup %1695 }
0x1bdf   : > { %v1126_v24 = vmul.f32 %v1696_v23, %v1124_v22  ;;  %vm1131_vm8 = vweird.f32 %v1696_v23 }
0x1be0   : > { %vm1132_vm10 = vmor %vm1130_vm9, %vm1131_vm8 }
0x1be1   : > { %v1127_v25 = vsub.f32 1.0, %v1126_v24 }
0x1be3   : > { %v1128_v26 = vmul.f32 %v1696_v23, %v1127_v25 }
0x1be5   : > { %v1129_v27 = vadd.f32 %v1696_v23, %v1128_v26 }
0x1be7   : > { %v1133_v30 = vsel %vm1132_vm10, %v1696_v23, %v1129_v27 }
0x1be8   : > { %v1138_v33 = vsel %vm1135_vm11, %v1137_v31, %v1133_v30  ;;  %v1300_v30 = vld [vmem:[%s1796_s17] sm:$0xf] }
0x1be9   : > { %v1141_v35 = vmul.f32 %v1138_v33, %v1083_v11 }
0x1c2e   : > { %v1144_v32 = vpop.permute.xlu2 %1143 }
0x1c2f   : > { %v1146_v34 = vmul.f32 %v1144_v32, %v1138_v33 }
0x1c31   : > { %1148 = vrot.lane.b32.xlu0 %v1146_v34, %s1752_s28 }
0x1ca3   : > { %v1149_v36 = vpop.permute.xlu0 %1148 }
0x1ca4   : > { %v1151_v37 = vadd.f32 %v1149_v36, %v1141_v35 }
0x1ca6   : > { %1697 = vtanh.f32 %v1151_v37 }
0x1cac   : > { %v1698_v4 = vpop.eup %1697 }
0x1cad   : > { %1154 = vrot.lane.b32.xlu1 %v1698_v4, %s1751_s27 }
0x1d1f   : > { %v1155_v38 = vpop.permute.xlu1 %1154 }
0x1d20   : > { %v1157_v39 = vmul.f32 %v1155_v38, %v1138_v33 }
0x1d22   : > { %1159 = vrot.lane.b32.xlu2 %v1157_v39, %s1752_s28 }
0x1d7c   : > { %v1160_v40 = vpop.permute.xlu2 %1159 }
0x1d7d   : > { %1548 = vst.msk [vmem:[%s1804_s23 + $0xc] sm:$0xf] %vm243_vm0, %v1160_v40  ;;  %1550 = vmatmul.msk.f32.vlgmr.msrb.gmra.mxu1 %vm819_vm5, %v1160_v40 }
0x1dfa   : > { %v1185_v41 = vpop.f32.mrf.mxu1 }
0x1dfb   : > { %v1188_v2 = vadd.f32 %v1549_v3, %v1185_v41 }
0x1dfd   : > { %1699 = vtanh.f32 %v1188_v2  ;;  %v1551_v43 = vmul.f32 -1.442695, %v1188_v2 }
0x1dff   : > { %1701 = vpow2.f32 %v1551_v43 }
0x1e03   : > { %v1700_v42 = vpop.eup %1699 }
0x1e04   : > { %1211 = vrot.lane.b32.xlu0 %v1700_v42, %s1751_s27 }
0x1e05   : > { %v1702_v44 = vpop.eup %1701 }
0x1e06   : > { %v1192_v1 = vadd.f32 1.0, %v1702_v44 }
0x1e08   : > { %1703 = vrcp.f32 %v1192_v1  ;;  %v1204_v50 = vand.u32 2147483648, %v1192_v1  ;;  %vm1198_vm13 = vweird.f32 %v1192_v1  ;;  %v1202_v51 = vand.u32 2147483647, %v1192_v1 }
0x1e0a   : > { %v1205_v53 = vor.u32 1.1754944e-38, %v1204_v50  ;;  %vm1203_vm15 = vcmp.eq.f32.partialorder %v1202_v51, 8.507059e+37 }
0x1e0e   : > { %v1704_v45 = vpop.eup %1703 }
0x1e0f   : > { %v1194_v46 = vmul.f32 %v1704_v45, %v1192_v1  ;;  %vm1199_vm12 = vweird.f32 %v1704_v45 }
0x1e10   : > { %vm1200_vm14 = vmor %vm1198_vm13, %vm1199_vm12 }
0x1e11   : > { %v1195_v47 = vsub.f32 1.0, %v1194_v46 }
0x1e13   : > { %v1196_v48 = vmul.f32 %v1704_v45, %v1195_v47 }
0x1e15   : > { %v1197_v49 = vadd.f32 %v1704_v45, %v1196_v48 }
0x1e17   : > { %v1201_v52 = vsel %vm1200_vm14, %v1704_v45, %v1197_v49 }
0x1e18   : > { %v1206_v55 = vsel %vm1203_vm15, %v1205_v53, %v1201_v52 }
0x1e19   : > { %v1209_v57 = vmul.f32 %v1206_v55, %v1151_v37 }
0x1e76   : > { %v1212_v54 = vpop.permute.xlu0 %1211 }
0x1e77   : > { %v1214_v56 = vmul.f32 %v1212_v54, %v1206_v55 }
0x1e79   : > { %1216 = vrot.lane.b32.xlu1 %v1214_v56, %s1752_s28 }
0x1eeb   : > { %v1217_v58 = vpop.permute.xlu1 %1216 }
0x1eec   : > { %v1219_v59 = vadd.f32 %v1217_v58, %v1209_v57 }
0x1eee   : > { %1705 = vtanh.f32 %v1219_v59 }
0x1ef4   : > { %v1706_v60 = vpop.eup %1705 }
0x1ef5   : > { %1222 = vrot.lane.b32.xlu2 %v1706_v60, %s1751_s27 }
0x1f4f   : > { %v1223_v61 = vpop.permute.xlu2 %1222 }
0x1f50   : > { %v1225_v62 = vmul.f32 %v1223_v61, %v1206_v55 }
0x1f52   : > { %1227 = vrot.lane.b32.xlu0 %v1225_v62, %s1752_s28 }
0x1fc4   : > { %v1228_v63 = vpop.permute.xlu0 %1227 }
0x1fc5   : > { %1552 = vst.msk [vmem:[%s1804_s23 + $0x8] sm:$0xf] %vm243_vm0, %v1228_v63  ;;  %1554 = vmatmul.msk.f32.vlgmr.msrb.gmra.mxu2 %vm819_vm5, %v1228_v63 }
0x2048   : > { %v1253_v5 = vpop.f32.mrf.mxu2 }
0x2049   : > { %v1256_v6 = vadd.f32 %v1553_v0, %v1253_v5 }
0x204b   : > { %1707 = vtanh.f32 %v1256_v6  ;;  %v1555_v8 = vmul.f32 -1.442695, %v1256_v6 }
0x204d   : > { %1709 = vpow2.f32 %v1555_v8 }
0x2051   : > { %v1708_v7 = vpop.eup %1707 }
0x2052   : > { %1279 = vrot.lane.b32.xlu1 %v1708_v7, %s1751_s27 }
0x2053   : > { %v1710_v9 = vpop.eup %1709 }
0x2054   : > { %v1260_v10 = vadd.f32 1.0, %v1710_v9 }
0x2056   : > { %1711 = vrcp.f32 %v1260_v10  ;;  %v1272_v16 = vand.u32 2147483648, %v1260_v10  ;;  %vm1266_vm1 = vweird.f32 %v1260_v10  ;;  %v1270_v17 = vand.u32 2147483647, %v1260_v10 }
0x2058   : > { %v1273_v19 = vor.u32 1.1754944e-38, %v1272_v16  ;;  %vm1271_vm4 = vcmp.eq.f32.partialorder %v1270_v17, 8.507059e+37 }
0x205c   : > { %v1712_v11 = vpop.eup %1711 }
0x205d   : > { %v1262_v12 = vmul.f32 %v1712_v11, %v1260_v10  ;;  %vm1267_vm2 = vweird.f32 %v1712_v11 }
0x205e   : > { %vm1268_vm3 = vmor %vm1266_vm1, %vm1267_vm2 }
0x205f   : > { %v1263_v13 = vsub.f32 1.0, %v1262_v12 }
0x2061   : > { %v1264_v14 = vmul.f32 %v1712_v11, %v1263_v13 }
0x2063   : > { %v1265_v15 = vadd.f32 %v1712_v11, %v1264_v14 }
0x2065   : > { %v1269_v18 = vsel %vm1268_vm3, %v1712_v11, %v1265_v15 }
0x2066   : > { %v1274_v21 = vsel %vm1271_vm4, %v1273_v19, %v1269_v18 }
0x2067   : > { %v1277_v23 = vmul.f32 %v1274_v21, %v1219_v59 }
0x20c4   : > { %v1280_v20 = vpop.permute.xlu1 %1279 }
0x20c5   : > { %v1282_v22 = vmul.f32 %v1280_v20, %v1274_v21 }
0x20c7   : > { %1284 = vrot.lane.b32.xlu2 %v1282_v22, %s1752_s28 }
0x2121   : > { %v1285_v24 = vpop.permute.xlu2 %1284 }
0x2122   : > { %v1287_v25 = vadd.f32 %v1285_v24, %v1277_v23 }
0x2124   : > { %1713 = vtanh.f32 %v1287_v25 }
0x212a   : > { %v1714_v26 = vpop.eup %1713 }
0x212b   : > { %1290 = vrot.lane.b32.xlu0 %v1714_v26, %s1751_s27 }
0x219d   : > { %v1291_v27 = vpop.permute.xlu0 %1290 }
0x219e   : > { %v1293_v28 = vmul.f32 %v1291_v27, %v1274_v21 }
0x21a0   : > { %1295 = vrot.lane.b32.xlu1 %v1293_v28, %s1752_s28 }
0x2212   : > { %v1296_v29 = vpop.permute.xlu1 %1295 }
0x2213   : > { %1556 = vst.msk [vmem:[%s1804_s23 + $0x4] sm:$0xf] %vm243_vm0, %v1296_v29  ;;  %1557 = vmatmul.msk.f32.vlgmr.msrb.gmra.mxu3 %vm819_vm5, %v1296_v29 }
0x2296   : > { %v1320_v31 = vpop.f32.mrf.mxu3 }
0x2297   : > { %v1323_v32 = vadd.f32 %v1320_v31, %v1300_v30 }
0x2299   : > { %1715 = vtanh.f32 %v1323_v32  ;;  %v1558_v34 = vmul.f32 -1.442695, %v1323_v32 }
0x229b   : > { %1717 = vpow2.f32 %v1558_v34 }
0x229f   : > { %v1716_v33 = vpop.eup %1715 }
0x22a0   : > { %1346 = vrot.lane.b32.xlu2 %v1716_v33, %s1751_s27 }
0x22a1   : > { %v1718_v35 = vpop.eup %1717 }
0x22a2   : > { %v1327_v36 = vadd.f32 1.0, %v1718_v35 }
0x22a4   : > { %1719 = vrcp.f32 %v1327_v36  ;;  %v1339_v3 = vand.u32 2147483648, %v1327_v36  ;;  %vm1333_vm5 = vweird.f32 %v1327_v36  ;;  %v1337_v41 = vand.u32 2147483647, %v1327_v36 }
0x22a6   : > { %v1340_v42 = vor.u32 1.1754944e-38, %v1339_v3  ;;  %vm1338_vm8 = vcmp.eq.f32.partialorder %v1337_v41, 8.507059e+37 }
0x22aa   : > { %v1720_v37 = vpop.eup %1719 }
0x22ab   : > { %v1329_v4 = vmul.f32 %v1720_v37, %v1327_v36  ;;  %vm1334_vm6 = vweird.f32 %v1720_v37 }
0x22ac   : > { %vm1335_vm7 = vmor %vm1333_vm5, %vm1334_vm6 }
0x22ad   : > { %v1330_v38 = vsub.f32 1.0, %v1329_v4 }
0x22af   : > { %v1331_v39 = vmul.f32 %v1720_v37, %v1330_v38 }
0x22b1   : > { %v1332_v40 = vadd.f32 %v1720_v37, %v1331_v39 }
0x22b3   : > { %v1336_v2 = vsel %vm1335_vm7, %v1720_v37, %v1332_v40 }
0x22b4   : > { %v1341_v44 = vsel %vm1338_vm8, %v1340_v42, %v1336_v2 }
0x22b5   : > { %v1344_v45 = vmul.f32 %v1341_v44, %v1287_v25 }
0x22fa   : > { %v1347_v43 = vpop.permute.xlu2 %1346 }
0x22fb   : > { %v1349_v1 = vmul.f32 %v1347_v43, %v1341_v44 }
0x22fd   : > { %1351 = vrot.lane.b32.xlu0 %v1349_v1, %s1752_s28 }
0x236f   : > { %v1352_v46 = vpop.permute.xlu0 %1351 }
0x2370   : > { %v1354_v47 = vadd.f32 %v1352_v46, %v1344_v45 }
0x2372   : > { %1721 = vtanh.f32 %v1354_v47  ;;  %1368 = vrot.lane.b32.xlu0 %v1354_v47, %s1753_s29 }
0x2378   : > { %v1722_v48 = vpop.eup %1721 }
0x2379   : > { %1357 = vrot.lane.b32.xlu1 %v1722_v48, %s1751_s27 }
0x23e4   : > { %v1369_v49 = vpop.permute.xlu0 %1368 }
0x23e5   : > { %1371 = vst.msk [vmem:[#allocation3] sm:$0xf] %vm243_vm0, %v1369_v49 }
0x23eb   : > { %v1358_v50 = vpop.permute.xlu1 %1357 }
0x23ec   : > { %v1360_v51 = vmul.f32 %v1358_v50, %v1341_v44 }
0x23ee   : > { %1362 = vrot.lane.b32.xlu2 %v1360_v51, %s1752_s28 }
0x2448   : > { %v1363_v52 = vpop.permute.xlu2 %1362 }
0x2449   : > { %1365 = vst.msk [vmem:[%s1804_s23] sm:$0xf] %vm243_vm0, %v1363_v52 }
0x244a   : > { %1366 = vst.msk [vmem:[#allocation2] sm:$0xf] %vm243_vm0, %v1363_v52 }
0x244b PF: > { %s12_s11 = sadd.s32 1, %s1745_s11   ;;  %s2026_s9 = smov %s1741_s10 }
0x244c   : > { %p9_p7 = scmp.ge.s32.totalorder %s12_s11, 4   ;;  %s2027_s10 = smov %s2029_s12 }
0x244e   :  { %11 = sbr.rel (!%p9_p7) target bundleno = 2 (0x2), region = 101 }

</bundles_post_ra>
